<compile_context>
chip_gen: v5e
topology: v5e:2x2
jax: 0.10.0
libtpu: 0.0.40
codegen_flags: <defaults>
</compile_context>

<pallas_src>
import jax
import jax.numpy as jnp
from jax import lax
from jax.experimental import pallas as pl
from jax.experimental.pallas import tpu as pltpu


def _make_kernel(BT, L, D):
    """Build the per-batch-tile kernel (BT batch elements per grid step)."""

    def kernel(cw_ref, len_ref, mw_ref,            # scalar prefetch (SMEM)
               lens2d_ref, table_ref,               # (BT,1) lens VMEM, table HBM
               sq_ref,                              # out: (BT, D) squared errors
               slab, mwe_buf, c_sems, m_sems):      # scratch
        t = pl.program_id(0)
        base = t * BT

        def start_center_gathers(i, b, n):
            # Row gathers for valid positions only (padded positions skipped).
            @pl.loop(0, n)
            def _(j):
                idx = cw_ref[b, j]
                pltpu.make_async_copy(
                    table_ref.at[pl.ds(idx, 1), :],
                    slab.at[i, pl.ds(j, 1), :],
                    c_sems.at[i]).start()

        def wait_center_gathers(i, n):
            @pl.loop(0, n)
            def _(j):
                # Dummy-source descriptor: only dst shape + semaphore matter
                # for .wait() (same pattern as the paged-attention kernel).
                pltpu.make_async_copy(
                    table_ref.at[pl.ds(0, 1), :],
                    slab.at[i, pl.ds(j, 1), :],
                    c_sems.at[i]).wait()

        # ---- Phase 1: launch ALL row gathers of this batch tile -----------
        for i in range(BT):                        # static unroll (BT = 8)
            b = base + i
            n = jnp.minimum(len_ref[b], L)
            pltpu.make_async_copy(
                table_ref.at[pl.ds(mw_ref[b], 1), :],
                mwe_buf.at[pl.ds(i, 1), :],
                m_sems.at[i]).start()
            start_center_gathers(i, b, n)

        # ---- Phase 2: wait for them all ------------------------------------
        for i in range(BT):
            b = base + i
            n = jnp.minimum(len_ref[b], L)
            wait_center_gathers(i, n)
            pltpu.make_async_copy(
                table_ref.at[pl.ds(0, 1), :],
                mwe_buf.at[pl.ds(i, 1), :],
                m_sems.at[i]).wait()

        # ---- Phase 3: masked mean-pool + squared error on full vregs -------
        lens = lens2d_ref[...]                                     # (BT, 1) i32
        pos = lax.broadcasted_iota(jnp.int32, (BT, L, D), 1)       # seq index
        mask = pos < lens.reshape(BT, 1, 1)                        # (BT, L, D)
        summed = jnp.sum(jnp.where(mask, slab[...], 0.0), axis=1)  # (BT, D)
        inv_len = 1.0 / lens.astype(jnp.float32)                   # exact recip
        pooled = summed * inv_len                                  # (BT, D)
        diff = pooled - mwe_buf[...]
        sq_ref[...] = diff * diff                 # lane-dense (8, D) store

    return kernel


def mwe_mse_loss(embedding_table, center_words, center_words_len, mwe_words,
                 *, block_b=8):
    """Fused gather + masked-mean-pool + squared-error kernel.

    embedding_table: [V, D] f32   center_words: [B, L] int
    center_words_len: [B] int     mwe_words: [B] int
    Returns scalar MSE loss.
    """
    B, L = center_words.shape
    V, D = embedding_table.shape

    # Clamp indices like jnp.take / nn.Embedding's valid-range contract so
    # out-of-range padding ids can never drive an OOB gather DMA.
    center_words = jnp.clip(center_words.astype(jnp.int32), 0, V - 1)
    mwe_words = jnp.clip(mwe_words.astype(jnp.int32), 0, V - 1)
    center_words_len = center_words_len.astype(jnp.int32)

    BT = block_b
    Bp = ((B + BT - 1) // BT) * BT
    pad = Bp - B
    if pad:
        # Padded batch rows: len=1 (single gather of row 0) so nothing blows
        # up; their squared errors are sliced away before the final mean.
        center_words = jnp.pad(center_words, ((0, pad), (0, 0)))
        center_words_len = jnp.pad(center_words_len, (0, pad),
                                   constant_values=1)
        mwe_words = jnp.pad(mwe_words, (0, pad))

    lens2d = center_words_len.reshape(Bp, 1)       # vector-form lengths (VMEM)

    kernel = _make_kernel(BT, L, D)

    grid_spec = pltpu.PrefetchScalarGridSpec(
        num_scalar_prefetch=3,                     # center_words, lens, mwe
        grid=(Bp // BT,),
        in_specs=[
            pl.BlockSpec((BT, 1), lambda t, cw, ln, mw: (t, 0)),   # lens tile
            pl.BlockSpec(memory_space=pl.ANY),                     # table (HBM)
        ],
        out_specs=pl.BlockSpec((BT, D), lambda t, cw, ln, mw: (t, 0)),
        scratch_shapes=[
            pltpu.VMEM((BT, L, D), jnp.float32),   # gathered center-row slab
            pltpu.VMEM((BT, D), jnp.float32),      # gathered mwe rows
            pltpu.SemaphoreType.DMA((BT,)),        # center-row sems (shared/row)
            pltpu.SemaphoreType.DMA((BT,)),        # mwe-row sems
        ],
    )

    sq = pl.pallas_call(
        kernel,
        out_shape=jax.ShapeDtypeStruct((Bp, D), jnp.float32),
        grid_spec=grid_spec,
        compiler_params=pltpu.CompilerParams(
            dimension_semantics=("parallel",)),    # v7x megacore over batch tiles
    )(center_words, center_words_len, mwe_words, lens2d, embedding_table)

    # Tiny wrapper-side reduction (B*D elements) -> MSELoss mean.
    return jnp.sum(sq[:B]) / jnp.float32(B * D)


@jax.jit
def forward(embedding_table, center_words, center_words_len, mwe_words):
    """Full module forward. All gathers + pooling + MSE are inside the kernel."""
    return mwe_mse_loss(embedding_table, center_words, center_words_len,
                        mwe_words)


def reference(embedding_table, center_words, center_words_len, mwe_words):
    center_embs = jnp.take(embedding_table, center_words, axis=0)   # [B, L, D]
    mwe_embs = jnp.take(embedding_table, mwe_words, axis=0)         # [B, D]
    B, L, D = center_embs.shape
    mask = (jnp.arange(L)[None, :] < center_words_len[:, None])[..., None]
    pooled = jnp.sum(jnp.where(mask, center_embs, 0.0), axis=1) \
        / center_words_len.astype(jnp.float32)[:, None]
    return jnp.mean((pooled - mwe_embs) ** 2)


if __name__ == "__main__":
    B, L, D, VOCAB = 2, 8, 128, 64

    key = jax.random.PRNGKey(0)
    k_emb, k_cw, k_len, k_mwe = jax.random.split(key, 4)

    # Deterministic synthetic "learnt" embedding table (nn.Embedding weights).
    embedding_table = jax.random.normal(k_emb, (VOCAB, D), dtype=jnp.float32)

    center_words = jax.random.randint(k_cw, (B, L), 0, VOCAB)
    center_words_len = jax.random.randint(k_len, (B,), 1, L + 1)
    mwe_words = jax.random.randint(k_mwe, (B,), 0, VOCAB)

    loss = forward(embedding_table, center_words, center_words_len, mwe_words)
    loss = jax.block_until_ready(loss)

    ref = reference(embedding_table, center_words, center_words_len, mwe_words)
    assert jnp.allclose(loss, ref, rtol=1e-5, atol=1e-5), (loss, ref)

    # TODO(synk): the original module's `mwe_f` is an arbitrary injected callable;
    # masked mean pooling is implemented here as its canonical instantiation.
    print("KERNEL_OK")
</pallas_src>

<mosaic_0001>
module attributes {stable_mosaic.version = 11 : i64} {
  func.func @kernel(%arg0: i32, %arg1: memref<8x8xi32, #tpu.memory_space<smem>>, %arg2: memref<8xi32, #tpu.memory_space<smem>>, %arg3: memref<8xi32, #tpu.memory_space<smem>>, %arg4: memref<8x1xi32, #tpu.memory_space<vmem>>, %arg5: memref<64x128xf32, #tpu.memory_space<any>>, %arg6: memref<8x128xf32, #tpu.memory_space<vmem>>, %arg7: memref<8x8x128xf32, #tpu.memory_space<vmem>>, %arg8: memref<8x128xf32, #tpu.memory_space<vmem>>, %arg9: memref<8x!tpu.dma_semaphore, #tpu.memory_space<semaphore_mem>>, %arg10: memref<8x!tpu.dma_semaphore, #tpu.memory_space<semaphore_mem>>) attributes {dimension_semantics = [#tpu.dimension_semantics<parallel>], iteration_bounds = array<i64: 1>, scalar_prefetch = 3 : i64, scratch_operands = 4 : i64, tpu.core_type = #tpu.core_type<tc>, window_params = [{transform_indices = @transform_0, window_bounds = array<i64: 8, 1>}, {}, {transform_indices = @transform_2, window_bounds = array<i64: 8, 128>}]} {
    %c8_i32 = arith.constant 8 : i32
    %0 = arith.muli %arg0, %c8_i32 : i32
    %c0_i32 = arith.constant 0 : i32
    %1 = arith.addi %0, %c0_i32 : i32
    %2 = arith.index_cast %1 : i32 to index
    %3 = memref.load %arg2[%2] : memref<8xi32, #tpu.memory_space<smem>>
    %c8_i32_0 = arith.constant 8 : i32
    %4 = arith.minsi %3, %c8_i32_0 : i32
    %5 = arith.index_cast %1 : i32 to index
    %6 = memref.load %arg3[%5] : memref<8xi32, #tpu.memory_space<smem>>
    %c0_i32_1 = arith.constant 0 : i32
    %c0_i32_2 = arith.constant 0 : i32
    %7 = tpu.memref_slice %arg5[%6, %c0_i32_2] : memref<64x128xf32, #tpu.memory_space<any>> -> memref<1x128xf32, #tpu.memory_space<any>>
    %c0_i32_3 = arith.constant 0 : i32
    %c0_i32_4 = arith.constant 0 : i32
    %8 = tpu.memref_slice %arg8[%c0_i32_3, %c0_i32_4] : memref<8x128xf32, #tpu.memory_space<vmem>> -> memref<1x128xf32, #tpu.memory_space<vmem>>
    %9 = tpu.memref_slice %arg10[%c0_i32_1] : memref<8x!tpu.dma_semaphore, #tpu.memory_space<semaphore_mem>> -> memref<1x!tpu.dma_semaphore, #tpu.memory_space<semaphore_mem>>
    %10 = tpu.memref_squeeze %9 : memref<1x!tpu.dma_semaphore, #tpu.memory_space<semaphore_mem>> -> memref<!tpu.dma_semaphore, #tpu.memory_space<semaphore_mem>>
    tpu.enqueue_dma source(%7 : memref<1x128xf32, #tpu.memory_space<any>>) target(%8 : memref<1x128xf32, #tpu.memory_space<vmem>>) target_semaphore(%10 : memref<!tpu.dma_semaphore, #tpu.memory_space<semaphore_mem>>)
    %c0_i32_5 = arith.constant 0 : i32
    %11 = arith.subi %4, %c0_i32_5 : i32
    %c1_i32 = arith.constant 1 : i32
    %c1_i32_6 = arith.constant 1 : i32
    %12 = arith.subi %c1_i32, %c1_i32_6 : i32
    %13 = arith.addi %11, %12 : i32
    %c1_i32_7 = arith.constant 1 : i32
    %14 = arith.divsi %13, %c1_i32_7 : i32
    %c1_i32_8 = arith.constant 1 : i32
    %c0_i32_9 = arith.constant 0 : i32
    %c0_i32_10 = arith.constant 0 : i32
    %15 = arith.subi %14, %c0_i32_10 : i32
    %16 = arith.addi %c0_i32_10, %15 : i32
    %c1_i32_11 = arith.constant 1 : i32
    scf.for %arg11 = %c0_i32_10 to %16 step %c1_i32_11  : i32 {
      %259 = arith.muli %arg11, %c1_i32_8 : i32
      %260 = arith.addi %c0_i32_9, %259 : i32
      %261 = arith.index_cast %1 : i32 to index
      %262 = arith.index_cast %260 : i32 to index
      %263 = memref.load %arg1[%261, %262] : memref<8x8xi32, #tpu.memory_space<smem>>
      %c0_i32_234 = arith.constant 0 : i32
      %c0_i32_235 = arith.constant 0 : i32
      %c0_i32_236 = arith.constant 0 : i32
      %264 = tpu.memref_slice %arg5[%263, %c0_i32_236] : memref<64x128xf32, #tpu.memory_space<any>> -> memref<1x128xf32, #tpu.memory_space<any>>
      %c0_i32_237 = arith.constant 0 : i32
      %265 = tpu.memref_slice %arg7[%c0_i32_234, %260, %c0_i32_237] : memref<8x8x128xf32, #tpu.memory_space<vmem>> -> memref<1x1x128xf32, #tpu.memory_space<vmem>>
      %266 = tpu.memref_squeeze %265 : memref<1x1x128xf32, #tpu.memory_space<vmem>> -> memref<1x128xf32, #tpu.memory_space<vmem>>
      %267 = tpu.memref_slice %arg9[%c0_i32_235] : memref<8x!tpu.dma_semaphore, #tpu.memory_space<semaphore_mem>> -> memref<1x!tpu.dma_semaphore, #tpu.memory_space<semaphore_mem>>
      %268 = tpu.memref_squeeze %267 : memref<1x!tpu.dma_semaphore, #tpu.memory_space<semaphore_mem>> -> memref<!tpu.dma_semaphore, #tpu.memory_space<semaphore_mem>>
      tpu.enqueue_dma source(%264 : memref<1x128xf32, #tpu.memory_space<any>>) target(%266 : memref<1x128xf32, #tpu.memory_space<vmem>>) target_semaphore(%268 : memref<!tpu.dma_semaphore, #tpu.memory_space<semaphore_mem>>)
    }
    %c1_i32_12 = arith.constant 1 : i32
    %17 = arith.addi %0, %c1_i32_12 : i32
    %18 = arith.index_cast %17 : i32 to index
    %19 = memref.load %arg2[%18] : memref<8xi32, #tpu.memory_space<smem>>
    %c8_i32_13 = arith.constant 8 : i32
    %20 = arith.minsi %19, %c8_i32_13 : i32
    %21 = arith.index_cast %17 : i32 to index
    %22 = memref.load %arg3[%21] : memref<8xi32, #tpu.memory_space<smem>>
    %c1_i32_14 = arith.constant 1 : i32
    %c0_i32_15 = arith.constant 0 : i32
    %23 = tpu.memref_slice %arg5[%22, %c0_i32_15] : memref<64x128xf32, #tpu.memory_space<any>> -> memref<1x128xf32, #tpu.memory_space<any>>
    %c1_i32_16 = arith.constant 1 : i32
    %c0_i32_17 = arith.constant 0 : i32
    %24 = tpu.memref_slice %arg8[%c1_i32_16, %c0_i32_17] : memref<8x128xf32, #tpu.memory_space<vmem>> -> memref<1x128xf32, #tpu.memory_space<vmem>>
    %25 = tpu.memref_slice %arg10[%c1_i32_14] : memref<8x!tpu.dma_semaphore, #tpu.memory_space<semaphore_mem>> -> memref<1x!tpu.dma_semaphore, #tpu.memory_space<semaphore_mem>>
    %26 = tpu.memref_squeeze %25 : memref<1x!tpu.dma_semaphore, #tpu.memory_space<semaphore_mem>> -> memref<!tpu.dma_semaphore, #tpu.memory_space<semaphore_mem>>
    tpu.enqueue_dma source(%23 : memref<1x128xf32, #tpu.memory_space<any>>) target(%24 : memref<1x128xf32, #tpu.memory_space<vmem>>) target_semaphore(%26 : memref<!tpu.dma_semaphore, #tpu.memory_space<semaphore_mem>>)
    %c0_i32_18 = arith.constant 0 : i32
    %27 = arith.subi %20, %c0_i32_18 : i32
    %c1_i32_19 = arith.constant 1 : i32
    %c1_i32_20 = arith.constant 1 : i32
    %28 = arith.subi %c1_i32_19, %c1_i32_20 : i32
    %29 = arith.addi %27, %28 : i32
    %c1_i32_21 = arith.constant 1 : i32
    %30 = arith.divsi %29, %c1_i32_21 : i32
    %c1_i32_22 = arith.constant 1 : i32
    %c0_i32_23 = arith.constant 0 : i32
    %c0_i32_24 = arith.constant 0 : i32
    %31 = arith.subi %30, %c0_i32_24 : i32
    %32 = arith.addi %c0_i32_24, %31 : i32
    %c1_i32_25 = arith.constant 1 : i32
    scf.for %arg11 = %c0_i32_24 to %32 step %c1_i32_25  : i32 {
      %259 = arith.muli %arg11, %c1_i32_22 : i32
      %260 = arith.addi %c0_i32_23, %259 : i32
      %261 = arith.index_cast %17 : i32 to index
      %262 = arith.index_cast %260 : i32 to index
      %263 = memref.load %arg1[%261, %262] : memref<8x8xi32, #tpu.memory_space<smem>>
      %c1_i32_234 = arith.constant 1 : i32
      %c1_i32_235 = arith.constant 1 : i32
      %c0_i32_236 = arith.constant 0 : i32
      %264 = tpu.memref_slice %arg5[%263, %c0_i32_236] : memref<64x128xf32, #tpu.memory_space<any>> -> memref<1x128xf32, #tpu.memory_space<any>>
      %c0_i32_237 = arith.constant 0 : i32
      %265 = tpu.memref_slice %arg7[%c1_i32_234, %260, %c0_i32_237] : memref<8x8x128xf32, #tpu.memory_space<vmem>> -> memref<1x1x128xf32, #tpu.memory_space<vmem>>
      %266 = tpu.memref_squeeze %265 : memref<1x1x128xf32, #tpu.memory_space<vmem>> -> memref<1x128xf32, #tpu.memory_space<vmem>>
      %267 = tpu.memref_slice %arg9[%c1_i32_235] : memref<8x!tpu.dma_semaphore, #tpu.memory_space<semaphore_mem>> -> memref<1x!tpu.dma_semaphore, #tpu.memory_space<semaphore_mem>>
      %268 = tpu.memref_squeeze %267 : memref<1x!tpu.dma_semaphore, #tpu.memory_space<semaphore_mem>> -> memref<!tpu.dma_semaphore, #tpu.memory_space<semaphore_mem>>
      tpu.enqueue_dma source(%264 : memref<1x128xf32, #tpu.memory_space<any>>) target(%266 : memref<1x128xf32, #tpu.memory_space<vmem>>) target_semaphore(%268 : memref<!tpu.dma_semaphore, #tpu.memory_space<semaphore_mem>>)
    }
    %c2_i32 = arith.constant 2 : i32
    %33 = arith.addi %0, %c2_i32 : i32
    %34 = arith.index_cast %33 : i32 to index
    %35 = memref.load %arg2[%34] : memref<8xi32, #tpu.memory_space<smem>>
    %c8_i32_26 = arith.constant 8 : i32
    %36 = arith.minsi %35, %c8_i32_26 : i32
    %37 = arith.index_cast %33 : i32 to index
    %38 = memref.load %arg3[%37] : memref<8xi32, #tpu.memory_space<smem>>
    %c2_i32_27 = arith.constant 2 : i32
    %c0_i32_28 = arith.constant 0 : i32
    %39 = tpu.memref_slice %arg5[%38, %c0_i32_28] : memref<64x128xf32, #tpu.memory_space<any>> -> memref<1x128xf32, #tpu.memory_space<any>>
    %c2_i32_29 = arith.constant 2 : i32
    %c0_i32_30 = arith.constant 0 : i32
    %40 = tpu.memref_slice %arg8[%c2_i32_29, %c0_i32_30] : memref<8x128xf32, #tpu.memory_space<vmem>> -> memref<1x128xf32, #tpu.memory_space<vmem>>
    %41 = tpu.memref_slice %arg10[%c2_i32_27] : memref<8x!tpu.dma_semaphore, #tpu.memory_space<semaphore_mem>> -> memref<1x!tpu.dma_semaphore, #tpu.memory_space<semaphore_mem>>
    %42 = tpu.memref_squeeze %41 : memref<1x!tpu.dma_semaphore, #tpu.memory_space<semaphore_mem>> -> memref<!tpu.dma_semaphore, #tpu.memory_space<semaphore_mem>>
    tpu.enqueue_dma source(%39 : memref<1x128xf32, #tpu.memory_space<any>>) target(%40 : memref<1x128xf32, #tpu.memory_space<vmem>>) target_semaphore(%42 : memref<!tpu.dma_semaphore, #tpu.memory_space<semaphore_mem>>)
    %c0_i32_31 = arith.constant 0 : i32
    %43 = arith.subi %36, %c0_i32_31 : i32
    %c1_i32_32 = arith.constant 1 : i32
    %c1_i32_33 = arith.constant 1 : i32
    %44 = arith.subi %c1_i32_32, %c1_i32_33 : i32
    %45 = arith.addi %43, %44 : i32
    %c1_i32_34 = arith.constant 1 : i32
    %46 = arith.divsi %45, %c1_i32_34 : i32
    %c1_i32_35 = arith.constant 1 : i32
    %c0_i32_36 = arith.constant 0 : i32
    %c0_i32_37 = arith.constant 0 : i32
    %47 = arith.subi %46, %c0_i32_37 : i32
    %48 = arith.addi %c0_i32_37, %47 : i32
    %c1_i32_38 = arith.constant 1 : i32
    scf.for %arg11 = %c0_i32_37 to %48 step %c1_i32_38  : i32 {
      %259 = arith.muli %arg11, %c1_i32_35 : i32
      %260 = arith.addi %c0_i32_36, %259 : i32
      %261 = arith.index_cast %33 : i32 to index
      %262 = arith.index_cast %260 : i32 to index
      %263 = memref.load %arg1[%261, %262] : memref<8x8xi32, #tpu.memory_space<smem>>
      %c2_i32_234 = arith.constant 2 : i32
      %c2_i32_235 = arith.constant 2 : i32
      %c0_i32_236 = arith.constant 0 : i32
      %264 = tpu.memref_slice %arg5[%263, %c0_i32_236] : memref<64x128xf32, #tpu.memory_space<any>> -> memref<1x128xf32, #tpu.memory_space<any>>
      %c0_i32_237 = arith.constant 0 : i32
      %265 = tpu.memref_slice %arg7[%c2_i32_234, %260, %c0_i32_237] : memref<8x8x128xf32, #tpu.memory_space<vmem>> -> memref<1x1x128xf32, #tpu.memory_space<vmem>>
      %266 = tpu.memref_squeeze %265 : memref<1x1x128xf32, #tpu.memory_space<vmem>> -> memref<1x128xf32, #tpu.memory_space<vmem>>
      %267 = tpu.memref_slice %arg9[%c2_i32_235] : memref<8x!tpu.dma_semaphore, #tpu.memory_space<semaphore_mem>> -> memref<1x!tpu.dma_semaphore, #tpu.memory_space<semaphore_mem>>
      %268 = tpu.memref_squeeze %267 : memref<1x!tpu.dma_semaphore, #tpu.memory_space<semaphore_mem>> -> memref<!tpu.dma_semaphore, #tpu.memory_space<semaphore_mem>>
      tpu.enqueue_dma source(%264 : memref<1x128xf32, #tpu.memory_space<any>>) target(%266 : memref<1x128xf32, #tpu.memory_space<vmem>>) target_semaphore(%268 : memref<!tpu.dma_semaphore, #tpu.memory_space<semaphore_mem>>)
    }
    %c3_i32 = arith.constant 3 : i32
    %49 = arith.addi %0, %c3_i32 : i32
    %50 = arith.index_cast %49 : i32 to index
    %51 = memref.load %arg2[%50] : memref<8xi32, #tpu.memory_space<smem>>
    %c8_i32_39 = arith.constant 8 : i32
    %52 = arith.minsi %51, %c8_i32_39 : i32
    %53 = arith.index_cast %49 : i32 to index
    %54 = memref.load %arg3[%53] : memref<8xi32, #tpu.memory_space<smem>>
    %c3_i32_40 = arith.constant 3 : i32
    %c0_i32_41 = arith.constant 0 : i32
    %55 = tpu.memref_slice %arg5[%54, %c0_i32_41] : memref<64x128xf32, #tpu.memory_space<any>> -> memref<1x128xf32, #tpu.memory_space<any>>
    %c3_i32_42 = arith.constant 3 : i32
    %c0_i32_43 = arith.constant 0 : i32
    %56 = tpu.memref_slice %arg8[%c3_i32_42, %c0_i32_43] : memref<8x128xf32, #tpu.memory_space<vmem>> -> memref<1x128xf32, #tpu.memory_space<vmem>>
    %57 = tpu.memref_slice %arg10[%c3_i32_40] : memref<8x!tpu.dma_semaphore, #tpu.memory_space<semaphore_mem>> -> memref<1x!tpu.dma_semaphore, #tpu.memory_space<semaphore_mem>>
    %58 = tpu.memref_squeeze %57 : memref<1x!tpu.dma_semaphore, #tpu.memory_space<semaphore_mem>> -> memref<!tpu.dma_semaphore, #tpu.memory_space<semaphore_mem>>
    tpu.enqueue_dma source(%55 : memref<1x128xf32, #tpu.memory_space<any>>) target(%56 : memref<1x128xf32, #tpu.memory_space<vmem>>) target_semaphore(%58 : memref<!tpu.dma_semaphore, #tpu.memory_space<semaphore_mem>>)
    %c0_i32_44 = arith.constant 0 : i32
    %59 = arith.subi %52, %c0_i32_44 : i32
    %c1_i32_45 = arith.constant 1 : i32
    %c1_i32_46 = arith.constant 1 : i32
    %60 = arith.subi %c1_i32_45, %c1_i32_46 : i32
    %61 = arith.addi %59, %60 : i32
    %c1_i32_47 = arith.constant 1 : i32
    %62 = arith.divsi %61, %c1_i32_47 : i32
    %c1_i32_48 = arith.constant 1 : i32
    %c0_i32_49 = arith.constant 0 : i32
    %c0_i32_50 = arith.constant 0 : i32
    %63 = arith.subi %62, %c0_i32_50 : i32
    %64 = arith.addi %c0_i32_50, %63 : i32
    %c1_i32_51 = arith.constant 1 : i32
    scf.for %arg11 = %c0_i32_50 to %64 step %c1_i32_51  : i32 {
      %259 = arith.muli %arg11, %c1_i32_48 : i32
      %260 = arith.addi %c0_i32_49, %259 : i32
      %261 = arith.index_cast %49 : i32 to index
      %262 = arith.index_cast %260 : i32 to index
      %263 = memref.load %arg1[%261, %262] : memref<8x8xi32, #tpu.memory_space<smem>>
      %c3_i32_234 = arith.constant 3 : i32
      %c3_i32_235 = arith.constant 3 : i32
      %c0_i32_236 = arith.constant 0 : i32
      %264 = tpu.memref_slice %arg5[%263, %c0_i32_236] : memref<64x128xf32, #tpu.memory_space<any>> -> memref<1x128xf32, #tpu.memory_space<any>>
      %c0_i32_237 = arith.constant 0 : i32
      %265 = tpu.memref_slice %arg7[%c3_i32_234, %260, %c0_i32_237] : memref<8x8x128xf32, #tpu.memory_space<vmem>> -> memref<1x1x128xf32, #tpu.memory_space<vmem>>
      %266 = tpu.memref_squeeze %265 : memref<1x1x128xf32, #tpu.memory_space<vmem>> -> memref<1x128xf32, #tpu.memory_space<vmem>>
      %267 = tpu.memref_slice %arg9[%c3_i32_235] : memref<8x!tpu.dma_semaphore, #tpu.memory_space<semaphore_mem>> -> memref<1x!tpu.dma_semaphore, #tpu.memory_space<semaphore_mem>>
      %268 = tpu.memref_squeeze %267 : memref<1x!tpu.dma_semaphore, #tpu.memory_space<semaphore_mem>> -> memref<!tpu.dma_semaphore, #tpu.memory_space<semaphore_mem>>
      tpu.enqueue_dma source(%264 : memref<1x128xf32, #tpu.memory_space<any>>) target(%266 : memref<1x128xf32, #tpu.memory_space<vmem>>) target_semaphore(%268 : memref<!tpu.dma_semaphore, #tpu.memory_space<semaphore_mem>>)
    }
    %c4_i32 = arith.constant 4 : i32
    %65 = arith.addi %0, %c4_i32 : i32
    %66 = arith.index_cast %65 : i32 to index
    %67 = memref.load %arg2[%66] : memref<8xi32, #tpu.memory_space<smem>>
    %c8_i32_52 = arith.constant 8 : i32
    %68 = arith.minsi %67, %c8_i32_52 : i32
    %69 = arith.index_cast %65 : i32 to index
    %70 = memref.load %arg3[%69] : memref<8xi32, #tpu.memory_space<smem>>
    %c4_i32_53 = arith.constant 4 : i32
    %c0_i32_54 = arith.constant 0 : i32
    %71 = tpu.memref_slice %arg5[%70, %c0_i32_54] : memref<64x128xf32, #tpu.memory_space<any>> -> memref<1x128xf32, #tpu.memory_space<any>>
    %c4_i32_55 = arith.constant 4 : i32
    %c0_i32_56 = arith.constant 0 : i32
    %72 = tpu.memref_slice %arg8[%c4_i32_55, %c0_i32_56] : memref<8x128xf32, #tpu.memory_space<vmem>> -> memref<1x128xf32, #tpu.memory_space<vmem>>
    %73 = tpu.memref_slice %arg10[%c4_i32_53] : memref<8x!tpu.dma_semaphore, #tpu.memory_space<semaphore_mem>> -> memref<1x!tpu.dma_semaphore, #tpu.memory_space<semaphore_mem>>
    %74 = tpu.memref_squeeze %73 : memref<1x!tpu.dma_semaphore, #tpu.memory_space<semaphore_mem>> -> memref<!tpu.dma_semaphore, #tpu.memory_space<semaphore_mem>>
    tpu.enqueue_dma source(%71 : memref<1x128xf32, #tpu.memory_space<any>>) target(%72 : memref<1x128xf32, #tpu.memory_space<vmem>>) target_semaphore(%74 : memref<!tpu.dma_semaphore, #tpu.memory_space<semaphore_mem>>)
    %c0_i32_57 = arith.constant 0 : i32
    %75 = arith.subi %68, %c0_i32_57 : i32
    %c1_i32_58 = arith.constant 1 : i32
    %c1_i32_59 = arith.constant 1 : i32
    %76 = arith.subi %c1_i32_58, %c1_i32_59 : i32
    %77 = arith.addi %75, %76 : i32
    %c1_i32_60 = arith.constant 1 : i32
    %78 = arith.divsi %77, %c1_i32_60 : i32
    %c1_i32_61 = arith.constant 1 : i32
    %c0_i32_62 = arith.constant 0 : i32
    %c0_i32_63 = arith.constant 0 : i32
    %79 = arith.subi %78, %c0_i32_63 : i32
    %80 = arith.addi %c0_i32_63, %79 : i32
    %c1_i32_64 = arith.constant 1 : i32
    scf.for %arg11 = %c0_i32_63 to %80 step %c1_i32_64  : i32 {
      %259 = arith.muli %arg11, %c1_i32_61 : i32
      %260 = arith.addi %c0_i32_62, %259 : i32
      %261 = arith.index_cast %65 : i32 to index
      %262 = arith.index_cast %260 : i32 to index
      %263 = memref.load %arg1[%261, %262] : memref<8x8xi32, #tpu.memory_space<smem>>
      %c4_i32_234 = arith.constant 4 : i32
      %c4_i32_235 = arith.constant 4 : i32
      %c0_i32_236 = arith.constant 0 : i32
      %264 = tpu.memref_slice %arg5[%263, %c0_i32_236] : memref<64x128xf32, #tpu.memory_space<any>> -> memref<1x128xf32, #tpu.memory_space<any>>
      %c0_i32_237 = arith.constant 0 : i32
      %265 = tpu.memref_slice %arg7[%c4_i32_234, %260, %c0_i32_237] : memref<8x8x128xf32, #tpu.memory_space<vmem>> -> memref<1x1x128xf32, #tpu.memory_space<vmem>>
      %266 = tpu.memref_squeeze %265 : memref<1x1x128xf32, #tpu.memory_space<vmem>> -> memref<1x128xf32, #tpu.memory_space<vmem>>
      %267 = tpu.memref_slice %arg9[%c4_i32_235] : memref<8x!tpu.dma_semaphore, #tpu.memory_space<semaphore_mem>> -> memref<1x!tpu.dma_semaphore, #tpu.memory_space<semaphore_mem>>
      %268 = tpu.memref_squeeze %267 : memref<1x!tpu.dma_semaphore, #tpu.memory_space<semaphore_mem>> -> memref<!tpu.dma_semaphore, #tpu.memory_space<semaphore_mem>>
      tpu.enqueue_dma source(%264 : memref<1x128xf32, #tpu.memory_space<any>>) target(%266 : memref<1x128xf32, #tpu.memory_space<vmem>>) target_semaphore(%268 : memref<!tpu.dma_semaphore, #tpu.memory_space<semaphore_mem>>)
    }
    %c5_i32 = arith.constant 5 : i32
    %81 = arith.addi %0, %c5_i32 : i32
    %82 = arith.index_cast %81 : i32 to index
    %83 = memref.load %arg2[%82] : memref<8xi32, #tpu.memory_space<smem>>
    %c8_i32_65 = arith.constant 8 : i32
    %84 = arith.minsi %83, %c8_i32_65 : i32
    %85 = arith.index_cast %81 : i32 to index
    %86 = memref.load %arg3[%85] : memref<8xi32, #tpu.memory_space<smem>>
    %c5_i32_66 = arith.constant 5 : i32
    %c0_i32_67 = arith.constant 0 : i32
    %87 = tpu.memref_slice %arg5[%86, %c0_i32_67] : memref<64x128xf32, #tpu.memory_space<any>> -> memref<1x128xf32, #tpu.memory_space<any>>
    %c5_i32_68 = arith.constant 5 : i32
    %c0_i32_69 = arith.constant 0 : i32
    %88 = tpu.memref_slice %arg8[%c5_i32_68, %c0_i32_69] : memref<8x128xf32, #tpu.memory_space<vmem>> -> memref<1x128xf32, #tpu.memory_space<vmem>>
    %89 = tpu.memref_slice %arg10[%c5_i32_66] : memref<8x!tpu.dma_semaphore, #tpu.memory_space<semaphore_mem>> -> memref<1x!tpu.dma_semaphore, #tpu.memory_space<semaphore_mem>>
    %90 = tpu.memref_squeeze %89 : memref<1x!tpu.dma_semaphore, #tpu.memory_space<semaphore_mem>> -> memref<!tpu.dma_semaphore, #tpu.memory_space<semaphore_mem>>
    tpu.enqueue_dma source(%87 : memref<1x128xf32, #tpu.memory_space<any>>) target(%88 : memref<1x128xf32, #tpu.memory_space<vmem>>) target_semaphore(%90 : memref<!tpu.dma_semaphore, #tpu.memory_space<semaphore_mem>>)
    %c0_i32_70 = arith.constant 0 : i32
    %91 = arith.subi %84, %c0_i32_70 : i32
    %c1_i32_71 = arith.constant 1 : i32
    %c1_i32_72 = arith.constant 1 : i32
    %92 = arith.subi %c1_i32_71, %c1_i32_72 : i32
    %93 = arith.addi %91, %92 : i32
    %c1_i32_73 = arith.constant 1 : i32
    %94 = arith.divsi %93, %c1_i32_73 : i32
    %c1_i32_74 = arith.constant 1 : i32
    %c0_i32_75 = arith.constant 0 : i32
    %c0_i32_76 = arith.constant 0 : i32
    %95 = arith.subi %94, %c0_i32_76 : i32
    %96 = arith.addi %c0_i32_76, %95 : i32
    %c1_i32_77 = arith.constant 1 : i32
    scf.for %arg11 = %c0_i32_76 to %96 step %c1_i32_77  : i32 {
      %259 = arith.muli %arg11, %c1_i32_74 : i32
      %260 = arith.addi %c0_i32_75, %259 : i32
      %261 = arith.index_cast %81 : i32 to index
      %262 = arith.index_cast %260 : i32 to index
      %263 = memref.load %arg1[%261, %262] : memref<8x8xi32, #tpu.memory_space<smem>>
      %c5_i32_234 = arith.constant 5 : i32
      %c5_i32_235 = arith.constant 5 : i32
      %c0_i32_236 = arith.constant 0 : i32
      %264 = tpu.memref_slice %arg5[%263, %c0_i32_236] : memref<64x128xf32, #tpu.memory_space<any>> -> memref<1x128xf32, #tpu.memory_space<any>>
      %c0_i32_237 = arith.constant 0 : i32
      %265 = tpu.memref_slice %arg7[%c5_i32_234, %260, %c0_i32_237] : memref<8x8x128xf32, #tpu.memory_space<vmem>> -> memref<1x1x128xf32, #tpu.memory_space<vmem>>
      %266 = tpu.memref_squeeze %265 : memref<1x1x128xf32, #tpu.memory_space<vmem>> -> memref<1x128xf32, #tpu.memory_space<vmem>>
      %267 = tpu.memref_slice %arg9[%c5_i32_235] : memref<8x!tpu.dma_semaphore, #tpu.memory_space<semaphore_mem>> -> memref<1x!tpu.dma_semaphore, #tpu.memory_space<semaphore_mem>>
      %268 = tpu.memref_squeeze %267 : memref<1x!tpu.dma_semaphore, #tpu.memory_space<semaphore_mem>> -> memref<!tpu.dma_semaphore, #tpu.memory_space<semaphore_mem>>
      tpu.enqueue_dma source(%264 : memref<1x128xf32, #tpu.memory_space<any>>) target(%266 : memref<1x128xf32, #tpu.memory_space<vmem>>) target_semaphore(%268 : memref<!tpu.dma_semaphore, #tpu.memory_space<semaphore_mem>>)
    }
    %c6_i32 = arith.constant 6 : i32
    %97 = arith.addi %0, %c6_i32 : i32
    %98 = arith.index_cast %97 : i32 to index
    %99 = memref.load %arg2[%98] : memref<8xi32, #tpu.memory_space<smem>>
    %c8_i32_78 = arith.constant 8 : i32
    %100 = arith.minsi %99, %c8_i32_78 : i32
    %101 = arith.index_cast %97 : i32 to index
    %102 = memref.load %arg3[%101] : memref<8xi32, #tpu.memory_space<smem>>
    %c6_i32_79 = arith.constant 6 : i32
    %c0_i32_80 = arith.constant 0 : i32
    %103 = tpu.memref_slice %arg5[%102, %c0_i32_80] : memref<64x128xf32, #tpu.memory_space<any>> -> memref<1x128xf32, #tpu.memory_space<any>>
    %c6_i32_81 = arith.constant 6 : i32
    %c0_i32_82 = arith.constant 0 : i32
    %104 = tpu.memref_slice %arg8[%c6_i32_81, %c0_i32_82] : memref<8x128xf32, #tpu.memory_space<vmem>> -> memref<1x128xf32, #tpu.memory_space<vmem>>
    %105 = tpu.memref_slice %arg10[%c6_i32_79] : memref<8x!tpu.dma_semaphore, #tpu.memory_space<semaphore_mem>> -> memref<1x!tpu.dma_semaphore, #tpu.memory_space<semaphore_mem>>
    %106 = tpu.memref_squeeze %105 : memref<1x!tpu.dma_semaphore, #tpu.memory_space<semaphore_mem>> -> memref<!tpu.dma_semaphore, #tpu.memory_space<semaphore_mem>>
    tpu.enqueue_dma source(%103 : memref<1x128xf32, #tpu.memory_space<any>>) target(%104 : memref<1x128xf32, #tpu.memory_space<vmem>>) target_semaphore(%106 : memref<!tpu.dma_semaphore, #tpu.memory_space<semaphore_mem>>)
    %c0_i32_83 = arith.constant 0 : i32
    %107 = arith.subi %100, %c0_i32_83 : i32
    %c1_i32_84 = arith.constant 1 : i32
    %c1_i32_85 = arith.constant 1 : i32
    %108 = arith.subi %c1_i32_84, %c1_i32_85 : i32
    %109 = arith.addi %107, %108 : i32
    %c1_i32_86 = arith.constant 1 : i32
    %110 = arith.divsi %109, %c1_i32_86 : i32
    %c1_i32_87 = arith.constant 1 : i32
    %c0_i32_88 = arith.constant 0 : i32
    %c0_i32_89 = arith.constant 0 : i32
    %111 = arith.subi %110, %c0_i32_89 : i32
    %112 = arith.addi %c0_i32_89, %111 : i32
    %c1_i32_90 = arith.constant 1 : i32
    scf.for %arg11 = %c0_i32_89 to %112 step %c1_i32_90  : i32 {
      %259 = arith.muli %arg11, %c1_i32_87 : i32
      %260 = arith.addi %c0_i32_88, %259 : i32
      %261 = arith.index_cast %97 : i32 to index
      %262 = arith.index_cast %260 : i32 to index
      %263 = memref.load %arg1[%261, %262] : memref<8x8xi32, #tpu.memory_space<smem>>
      %c6_i32_234 = arith.constant 6 : i32
      %c6_i32_235 = arith.constant 6 : i32
      %c0_i32_236 = arith.constant 0 : i32
      %264 = tpu.memref_slice %arg5[%263, %c0_i32_236] : memref<64x128xf32, #tpu.memory_space<any>> -> memref<1x128xf32, #tpu.memory_space<any>>
      %c0_i32_237 = arith.constant 0 : i32
      %265 = tpu.memref_slice %arg7[%c6_i32_234, %260, %c0_i32_237] : memref<8x8x128xf32, #tpu.memory_space<vmem>> -> memref<1x1x128xf32, #tpu.memory_space<vmem>>
      %266 = tpu.memref_squeeze %265 : memref<1x1x128xf32, #tpu.memory_space<vmem>> -> memref<1x128xf32, #tpu.memory_space<vmem>>
      %267 = tpu.memref_slice %arg9[%c6_i32_235] : memref<8x!tpu.dma_semaphore, #tpu.memory_space<semaphore_mem>> -> memref<1x!tpu.dma_semaphore, #tpu.memory_space<semaphore_mem>>
      %268 = tpu.memref_squeeze %267 : memref<1x!tpu.dma_semaphore, #tpu.memory_space<semaphore_mem>> -> memref<!tpu.dma_semaphore, #tpu.memory_space<semaphore_mem>>
      tpu.enqueue_dma source(%264 : memref<1x128xf32, #tpu.memory_space<any>>) target(%266 : memref<1x128xf32, #tpu.memory_space<vmem>>) target_semaphore(%268 : memref<!tpu.dma_semaphore, #tpu.memory_space<semaphore_mem>>)
    }
    %c7_i32 = arith.constant 7 : i32
    %113 = arith.addi %0, %c7_i32 : i32
    %114 = arith.index_cast %113 : i32 to index
    %115 = memref.load %arg2[%114] : memref<8xi32, #tpu.memory_space<smem>>
    %c8_i32_91 = arith.constant 8 : i32
    %116 = arith.minsi %115, %c8_i32_91 : i32
    %117 = arith.index_cast %113 : i32 to index
    %118 = memref.load %arg3[%117] : memref<8xi32, #tpu.memory_space<smem>>
    %c7_i32_92 = arith.constant 7 : i32
    %c0_i32_93 = arith.constant 0 : i32
    %119 = tpu.memref_slice %arg5[%118, %c0_i32_93] : memref<64x128xf32, #tpu.memory_space<any>> -> memref<1x128xf32, #tpu.memory_space<any>>
    %c7_i32_94 = arith.constant 7 : i32
    %c0_i32_95 = arith.constant 0 : i32
    %120 = tpu.memref_slice %arg8[%c7_i32_94, %c0_i32_95] : memref<8x128xf32, #tpu.memory_space<vmem>> -> memref<1x128xf32, #tpu.memory_space<vmem>>
    %121 = tpu.memref_slice %arg10[%c7_i32_92] : memref<8x!tpu.dma_semaphore, #tpu.memory_space<semaphore_mem>> -> memref<1x!tpu.dma_semaphore, #tpu.memory_space<semaphore_mem>>
    %122 = tpu.memref_squeeze %121 : memref<1x!tpu.dma_semaphore, #tpu.memory_space<semaphore_mem>> -> memref<!tpu.dma_semaphore, #tpu.memory_space<semaphore_mem>>
    tpu.enqueue_dma source(%119 : memref<1x128xf32, #tpu.memory_space<any>>) target(%120 : memref<1x128xf32, #tpu.memory_space<vmem>>) target_semaphore(%122 : memref<!tpu.dma_semaphore, #tpu.memory_space<semaphore_mem>>)
    %c0_i32_96 = arith.constant 0 : i32
    %123 = arith.subi %116, %c0_i32_96 : i32
    %c1_i32_97 = arith.constant 1 : i32
    %c1_i32_98 = arith.constant 1 : i32
    %124 = arith.subi %c1_i32_97, %c1_i32_98 : i32
    %125 = arith.addi %123, %124 : i32
    %c1_i32_99 = arith.constant 1 : i32
    %126 = arith.divsi %125, %c1_i32_99 : i32
    %c1_i32_100 = arith.constant 1 : i32
    %c0_i32_101 = arith.constant 0 : i32
    %c0_i32_102 = arith.constant 0 : i32
    %127 = arith.subi %126, %c0_i32_102 : i32
    %128 = arith.addi %c0_i32_102, %127 : i32
    %c1_i32_103 = arith.constant 1 : i32
    scf.for %arg11 = %c0_i32_102 to %128 step %c1_i32_103  : i32 {
      %259 = arith.muli %arg11, %c1_i32_100 : i32
      %260 = arith.addi %c0_i32_101, %259 : i32
      %261 = arith.index_cast %113 : i32 to index
      %262 = arith.index_cast %260 : i32 to index
      %263 = memref.load %arg1[%261, %262] : memref<8x8xi32, #tpu.memory_space<smem>>
      %c7_i32_234 = arith.constant 7 : i32
      %c7_i32_235 = arith.constant 7 : i32
      %c0_i32_236 = arith.constant 0 : i32
      %264 = tpu.memref_slice %arg5[%263, %c0_i32_236] : memref<64x128xf32, #tpu.memory_space<any>> -> memref<1x128xf32, #tpu.memory_space<any>>
      %c0_i32_237 = arith.constant 0 : i32
      %265 = tpu.memref_slice %arg7[%c7_i32_234, %260, %c0_i32_237] : memref<8x8x128xf32, #tpu.memory_space<vmem>> -> memref<1x1x128xf32, #tpu.memory_space<vmem>>
      %266 = tpu.memref_squeeze %265 : memref<1x1x128xf32, #tpu.memory_space<vmem>> -> memref<1x128xf32, #tpu.memory_space<vmem>>
      %267 = tpu.memref_slice %arg9[%c7_i32_235] : memref<8x!tpu.dma_semaphore, #tpu.memory_space<semaphore_mem>> -> memref<1x!tpu.dma_semaphore, #tpu.memory_space<semaphore_mem>>
      %268 = tpu.memref_squeeze %267 : memref<1x!tpu.dma_semaphore, #tpu.memory_space<semaphore_mem>> -> memref<!tpu.dma_semaphore, #tpu.memory_space<semaphore_mem>>
      tpu.enqueue_dma source(%264 : memref<1x128xf32, #tpu.memory_space<any>>) target(%266 : memref<1x128xf32, #tpu.memory_space<vmem>>) target_semaphore(%268 : memref<!tpu.dma_semaphore, #tpu.memory_space<semaphore_mem>>)
    }
    %c0_i32_104 = arith.constant 0 : i32
    %129 = arith.addi %0, %c0_i32_104 : i32
    %130 = arith.index_cast %129 : i32 to index
    %131 = memref.load %arg2[%130] : memref<8xi32, #tpu.memory_space<smem>>
    %c8_i32_105 = arith.constant 8 : i32
    %132 = arith.minsi %131, %c8_i32_105 : i32
    %c0_i32_106 = arith.constant 0 : i32
    %133 = arith.subi %132, %c0_i32_106 : i32
    %c1_i32_107 = arith.constant 1 : i32
    %c1_i32_108 = arith.constant 1 : i32
    %134 = arith.subi %c1_i32_107, %c1_i32_108 : i32
    %135 = arith.addi %133, %134 : i32
    %c1_i32_109 = arith.constant 1 : i32
    %136 = arith.divsi %135, %c1_i32_109 : i32
    %c1_i32_110 = arith.constant 1 : i32
    %c0_i32_111 = arith.constant 0 : i32
    %c0_i32_112 = arith.constant 0 : i32
    %137 = arith.subi %136, %c0_i32_112 : i32
    %138 = arith.addi %c0_i32_112, %137 : i32
    %c1_i32_113 = arith.constant 1 : i32
    scf.for %arg11 = %c0_i32_112 to %138 step %c1_i32_113  : i32 {
      %259 = arith.muli %arg11, %c1_i32_110 : i32
      %260 = arith.addi %c0_i32_111, %259 : i32
      %c0_i32_234 = arith.constant 0 : i32
      %c0_i32_235 = arith.constant 0 : i32
      %c0_i32_236 = arith.constant 0 : i32
      %c0_i32_237 = arith.constant 0 : i32
      %261 = tpu.memref_slice %arg5[%c0_i32_236, %c0_i32_237] : memref<64x128xf32, #tpu.memory_space<any>> -> memref<1x128xf32, #tpu.memory_space<any>>
      %c0_i32_238 = arith.constant 0 : i32
      %262 = tpu.memref_slice %arg7[%c0_i32_234, %260, %c0_i32_238] : memref<8x8x128xf32, #tpu.memory_space<vmem>> -> memref<1x1x128xf32, #tpu.memory_space<vmem>>
      %263 = tpu.memref_squeeze %262 : memref<1x1x128xf32, #tpu.memory_space<vmem>> -> memref<1x128xf32, #tpu.memory_space<vmem>>
      %264 = tpu.memref_slice %arg9[%c0_i32_235] : memref<8x!tpu.dma_semaphore, #tpu.memory_space<semaphore_mem>> -> memref<1x!tpu.dma_semaphore, #tpu.memory_space<semaphore_mem>>
      %265 = tpu.memref_squeeze %264 : memref<1x!tpu.dma_semaphore, #tpu.memory_space<semaphore_mem>> -> memref<!tpu.dma_semaphore, #tpu.memory_space<semaphore_mem>>
      tpu.wait_dma2 semaphore(%265 : memref<!tpu.dma_semaphore, #tpu.memory_space<semaphore_mem>>) src(%261 : memref<1x128xf32, #tpu.memory_space<any>>) dst(%263 : memref<1x128xf32, #tpu.memory_space<vmem>>)
    }
    %c0_i32_114 = arith.constant 0 : i32
    %c0_i32_115 = arith.constant 0 : i32
    %c0_i32_116 = arith.constant 0 : i32
    %139 = tpu.memref_slice %arg5[%c0_i32_115, %c0_i32_116] : memref<64x128xf32, #tpu.memory_space<any>> -> memref<1x128xf32, #tpu.memory_space<any>>
    %c0_i32_117 = arith.constant 0 : i32
    %c0_i32_118 = arith.constant 0 : i32
    %140 = tpu.memref_slice %arg8[%c0_i32_117, %c0_i32_118] : memref<8x128xf32, #tpu.memory_space<vmem>> -> memref<1x128xf32, #tpu.memory_space<vmem>>
    %141 = tpu.memref_slice %arg10[%c0_i32_114] : memref<8x!tpu.dma_semaphore, #tpu.memory_space<semaphore_mem>> -> memref<1x!tpu.dma_semaphore, #tpu.memory_space<semaphore_mem>>
    %142 = tpu.memref_squeeze %141 : memref<1x!tpu.dma_semaphore, #tpu.memory_space<semaphore_mem>> -> memref<!tpu.dma_semaphore, #tpu.memory_space<semaphore_mem>>
    tpu.wait_dma2 semaphore(%142 : memref<!tpu.dma_semaphore, #tpu.memory_space<semaphore_mem>>) src(%139 : memref<1x128xf32, #tpu.memory_space<any>>) dst(%140 : memref<1x128xf32, #tpu.memory_space<vmem>>)
    %c1_i32_119 = arith.constant 1 : i32
    %143 = arith.addi %0, %c1_i32_119 : i32
    %144 = arith.index_cast %143 : i32 to index
    %145 = memref.load %arg2[%144] : memref<8xi32, #tpu.memory_space<smem>>
    %c8_i32_120 = arith.constant 8 : i32
    %146 = arith.minsi %145, %c8_i32_120 : i32
    %c0_i32_121 = arith.constant 0 : i32
    %147 = arith.subi %146, %c0_i32_121 : i32
    %c1_i32_122 = arith.constant 1 : i32
    %c1_i32_123 = arith.constant 1 : i32
    %148 = arith.subi %c1_i32_122, %c1_i32_123 : i32
    %149 = arith.addi %147, %148 : i32
    %c1_i32_124 = arith.constant 1 : i32
    %150 = arith.divsi %149, %c1_i32_124 : i32
    %c1_i32_125 = arith.constant 1 : i32
    %c0_i32_126 = arith.constant 0 : i32
    %c0_i32_127 = arith.constant 0 : i32
    %151 = arith.subi %150, %c0_i32_127 : i32
    %152 = arith.addi %c0_i32_127, %151 : i32
    %c1_i32_128 = arith.constant 1 : i32
    scf.for %arg11 = %c0_i32_127 to %152 step %c1_i32_128  : i32 {
      %259 = arith.muli %arg11, %c1_i32_125 : i32
      %260 = arith.addi %c0_i32_126, %259 : i32
      %c1_i32_234 = arith.constant 1 : i32
      %c1_i32_235 = arith.constant 1 : i32
      %c0_i32_236 = arith.constant 0 : i32
      %c0_i32_237 = arith.constant 0 : i32
      %261 = tpu.memref_slice %arg5[%c0_i32_236, %c0_i32_237] : memref<64x128xf32, #tpu.memory_space<any>> -> memref<1x128xf32, #tpu.memory_space<any>>
      %c0_i32_238 = arith.constant 0 : i32
      %262 = tpu.memref_slice %arg7[%c1_i32_234, %260, %c0_i32_238] : memref<8x8x128xf32, #tpu.memory_space<vmem>> -> memref<1x1x128xf32, #tpu.memory_space<vmem>>
      %263 = tpu.memref_squeeze %262 : memref<1x1x128xf32, #tpu.memory_space<vmem>> -> memref<1x128xf32, #tpu.memory_space<vmem>>
      %264 = tpu.memref_slice %arg9[%c1_i32_235] : memref<8x!tpu.dma_semaphore, #tpu.memory_space<semaphore_mem>> -> memref<1x!tpu.dma_semaphore, #tpu.memory_space<semaphore_mem>>
      %265 = tpu.memref_squeeze %264 : memref<1x!tpu.dma_semaphore, #tpu.memory_space<semaphore_mem>> -> memref<!tpu.dma_semaphore, #tpu.memory_space<semaphore_mem>>
      tpu.wait_dma2 semaphore(%265 : memref<!tpu.dma_semaphore, #tpu.memory_space<semaphore_mem>>) src(%261 : memref<1x128xf32, #tpu.memory_space<any>>) dst(%263 : memref<1x128xf32, #tpu.memory_space<vmem>>)
    }
    %c1_i32_129 = arith.constant 1 : i32
    %c0_i32_130 = arith.constant 0 : i32
    %c0_i32_131 = arith.constant 0 : i32
    %153 = tpu.memref_slice %arg5[%c0_i32_130, %c0_i32_131] : memref<64x128xf32, #tpu.memory_space<any>> -> memref<1x128xf32, #tpu.memory_space<any>>
    %c1_i32_132 = arith.constant 1 : i32
    %c0_i32_133 = arith.constant 0 : i32
    %154 = tpu.memref_slice %arg8[%c1_i32_132, %c0_i32_133] : memref<8x128xf32, #tpu.memory_space<vmem>> -> memref<1x128xf32, #tpu.memory_space<vmem>>
    %155 = tpu.memref_slice %arg10[%c1_i32_129] : memref<8x!tpu.dma_semaphore, #tpu.memory_space<semaphore_mem>> -> memref<1x!tpu.dma_semaphore, #tpu.memory_space<semaphore_mem>>
    %156 = tpu.memref_squeeze %155 : memref<1x!tpu.dma_semaphore, #tpu.memory_space<semaphore_mem>> -> memref<!tpu.dma_semaphore, #tpu.memory_space<semaphore_mem>>
    tpu.wait_dma2 semaphore(%156 : memref<!tpu.dma_semaphore, #tpu.memory_space<semaphore_mem>>) src(%153 : memref<1x128xf32, #tpu.memory_space<any>>) dst(%154 : memref<1x128xf32, #tpu.memory_space<vmem>>)
    %c2_i32_134 = arith.constant 2 : i32
    %157 = arith.addi %0, %c2_i32_134 : i32
    %158 = arith.index_cast %157 : i32 to index
    %159 = memref.load %arg2[%158] : memref<8xi32, #tpu.memory_space<smem>>
    %c8_i32_135 = arith.constant 8 : i32
    %160 = arith.minsi %159, %c8_i32_135 : i32
    %c0_i32_136 = arith.constant 0 : i32
    %161 = arith.subi %160, %c0_i32_136 : i32
    %c1_i32_137 = arith.constant 1 : i32
    %c1_i32_138 = arith.constant 1 : i32
    %162 = arith.subi %c1_i32_137, %c1_i32_138 : i32
    %163 = arith.addi %161, %162 : i32
    %c1_i32_139 = arith.constant 1 : i32
    %164 = arith.divsi %163, %c1_i32_139 : i32
    %c1_i32_140 = arith.constant 1 : i32
    %c0_i32_141 = arith.constant 0 : i32
    %c0_i32_142 = arith.constant 0 : i32
    %165 = arith.subi %164, %c0_i32_142 : i32
    %166 = arith.addi %c0_i32_142, %165 : i32
    %c1_i32_143 = arith.constant 1 : i32
    scf.for %arg11 = %c0_i32_142 to %166 step %c1_i32_143  : i32 {
      %259 = arith.muli %arg11, %c1_i32_140 : i32
      %260 = arith.addi %c0_i32_141, %259 : i32
      %c2_i32_234 = arith.constant 2 : i32
      %c2_i32_235 = arith.constant 2 : i32
      %c0_i32_236 = arith.constant 0 : i32
      %c0_i32_237 = arith.constant 0 : i32
      %261 = tpu.memref_slice %arg5[%c0_i32_236, %c0_i32_237] : memref<64x128xf32, #tpu.memory_space<any>> -> memref<1x128xf32, #tpu.memory_space<any>>
      %c0_i32_238 = arith.constant 0 : i32
      %262 = tpu.memref_slice %arg7[%c2_i32_234, %260, %c0_i32_238] : memref<8x8x128xf32, #tpu.memory_space<vmem>> -> memref<1x1x128xf32, #tpu.memory_space<vmem>>
      %263 = tpu.memref_squeeze %262 : memref<1x1x128xf32, #tpu.memory_space<vmem>> -> memref<1x128xf32, #tpu.memory_space<vmem>>
      %264 = tpu.memref_slice %arg9[%c2_i32_235] : memref<8x!tpu.dma_semaphore, #tpu.memory_space<semaphore_mem>> -> memref<1x!tpu.dma_semaphore, #tpu.memory_space<semaphore_mem>>
      %265 = tpu.memref_squeeze %264 : memref<1x!tpu.dma_semaphore, #tpu.memory_space<semaphore_mem>> -> memref<!tpu.dma_semaphore, #tpu.memory_space<semaphore_mem>>
      tpu.wait_dma2 semaphore(%265 : memref<!tpu.dma_semaphore, #tpu.memory_space<semaphore_mem>>) src(%261 : memref<1x128xf32, #tpu.memory_space<any>>) dst(%263 : memref<1x128xf32, #tpu.memory_space<vmem>>)
    }
    %c2_i32_144 = arith.constant 2 : i32
    %c0_i32_145 = arith.constant 0 : i32
    %c0_i32_146 = arith.constant 0 : i32
    %167 = tpu.memref_slice %arg5[%c0_i32_145, %c0_i32_146] : memref<64x128xf32, #tpu.memory_space<any>> -> memref<1x128xf32, #tpu.memory_space<any>>
    %c2_i32_147 = arith.constant 2 : i32
    %c0_i32_148 = arith.constant 0 : i32
    %168 = tpu.memref_slice %arg8[%c2_i32_147, %c0_i32_148] : memref<8x128xf32, #tpu.memory_space<vmem>> -> memref<1x128xf32, #tpu.memory_space<vmem>>
    %169 = tpu.memref_slice %arg10[%c2_i32_144] : memref<8x!tpu.dma_semaphore, #tpu.memory_space<semaphore_mem>> -> memref<1x!tpu.dma_semaphore, #tpu.memory_space<semaphore_mem>>
    %170 = tpu.memref_squeeze %169 : memref<1x!tpu.dma_semaphore, #tpu.memory_space<semaphore_mem>> -> memref<!tpu.dma_semaphore, #tpu.memory_space<semaphore_mem>>
    tpu.wait_dma2 semaphore(%170 : memref<!tpu.dma_semaphore, #tpu.memory_space<semaphore_mem>>) src(%167 : memref<1x128xf32, #tpu.memory_space<any>>) dst(%168 : memref<1x128xf32, #tpu.memory_space<vmem>>)
    %c3_i32_149 = arith.constant 3 : i32
    %171 = arith.addi %0, %c3_i32_149 : i32
    %172 = arith.index_cast %171 : i32 to index
    %173 = memref.load %arg2[%172] : memref<8xi32, #tpu.memory_space<smem>>
    %c8_i32_150 = arith.constant 8 : i32
    %174 = arith.minsi %173, %c8_i32_150 : i32
    %c0_i32_151 = arith.constant 0 : i32
    %175 = arith.subi %174, %c0_i32_151 : i32
    %c1_i32_152 = arith.constant 1 : i32
    %c1_i32_153 = arith.constant 1 : i32
    %176 = arith.subi %c1_i32_152, %c1_i32_153 : i32
    %177 = arith.addi %175, %176 : i32
    %c1_i32_154 = arith.constant 1 : i32
    %178 = arith.divsi %177, %c1_i32_154 : i32
    %c1_i32_155 = arith.constant 1 : i32
    %c0_i32_156 = arith.constant 0 : i32
    %c0_i32_157 = arith.constant 0 : i32
    %179 = arith.subi %178, %c0_i32_157 : i32
    %180 = arith.addi %c0_i32_157, %179 : i32
    %c1_i32_158 = arith.constant 1 : i32
    scf.for %arg11 = %c0_i32_157 to %180 step %c1_i32_158  : i32 {
      %259 = arith.muli %arg11, %c1_i32_155 : i32
      %260 = arith.addi %c0_i32_156, %259 : i32
      %c3_i32_234 = arith.constant 3 : i32
      %c3_i32_235 = arith.constant 3 : i32
      %c0_i32_236 = arith.constant 0 : i32
      %c0_i32_237 = arith.constant 0 : i32
      %261 = tpu.memref_slice %arg5[%c0_i32_236, %c0_i32_237] : memref<64x128xf32, #tpu.memory_space<any>> -> memref<1x128xf32, #tpu.memory_space<any>>
      %c0_i32_238 = arith.constant 0 : i32
      %262 = tpu.memref_slice %arg7[%c3_i32_234, %260, %c0_i32_238] : memref<8x8x128xf32, #tpu.memory_space<vmem>> -> memref<1x1x128xf32, #tpu.memory_space<vmem>>
      %263 = tpu.memref_squeeze %262 : memref<1x1x128xf32, #tpu.memory_space<vmem>> -> memref<1x128xf32, #tpu.memory_space<vmem>>
      %264 = tpu.memref_slice %arg9[%c3_i32_235] : memref<8x!tpu.dma_semaphore, #tpu.memory_space<semaphore_mem>> -> memref<1x!tpu.dma_semaphore, #tpu.memory_space<semaphore_mem>>
      %265 = tpu.memref_squeeze %264 : memref<1x!tpu.dma_semaphore, #tpu.memory_space<semaphore_mem>> -> memref<!tpu.dma_semaphore, #tpu.memory_space<semaphore_mem>>
      tpu.wait_dma2 semaphore(%265 : memref<!tpu.dma_semaphore, #tpu.memory_space<semaphore_mem>>) src(%261 : memref<1x128xf32, #tpu.memory_space<any>>) dst(%263 : memref<1x128xf32, #tpu.memory_space<vmem>>)
    }
    %c3_i32_159 = arith.constant 3 : i32
    %c0_i32_160 = arith.constant 0 : i32
    %c0_i32_161 = arith.constant 0 : i32
    %181 = tpu.memref_slice %arg5[%c0_i32_160, %c0_i32_161] : memref<64x128xf32, #tpu.memory_space<any>> -> memref<1x128xf32, #tpu.memory_space<any>>
    %c3_i32_162 = arith.constant 3 : i32
    %c0_i32_163 = arith.constant 0 : i32
    %182 = tpu.memref_slice %arg8[%c3_i32_162, %c0_i32_163] : memref<8x128xf32, #tpu.memory_space<vmem>> -> memref<1x128xf32, #tpu.memory_space<vmem>>
    %183 = tpu.memref_slice %arg10[%c3_i32_159] : memref<8x!tpu.dma_semaphore, #tpu.memory_space<semaphore_mem>> -> memref<1x!tpu.dma_semaphore, #tpu.memory_space<semaphore_mem>>
    %184 = tpu.memref_squeeze %183 : memref<1x!tpu.dma_semaphore, #tpu.memory_space<semaphore_mem>> -> memref<!tpu.dma_semaphore, #tpu.memory_space<semaphore_mem>>
    tpu.wait_dma2 semaphore(%184 : memref<!tpu.dma_semaphore, #tpu.memory_space<semaphore_mem>>) src(%181 : memref<1x128xf32, #tpu.memory_space<any>>) dst(%182 : memref<1x128xf32, #tpu.memory_space<vmem>>)
    %c4_i32_164 = arith.constant 4 : i32
    %185 = arith.addi %0, %c4_i32_164 : i32
    %186 = arith.index_cast %185 : i32 to index
    %187 = memref.load %arg2[%186] : memref<8xi32, #tpu.memory_space<smem>>
    %c8_i32_165 = arith.constant 8 : i32
    %188 = arith.minsi %187, %c8_i32_165 : i32
    %c0_i32_166 = arith.constant 0 : i32
    %189 = arith.subi %188, %c0_i32_166 : i32
    %c1_i32_167 = arith.constant 1 : i32
    %c1_i32_168 = arith.constant 1 : i32
    %190 = arith.subi %c1_i32_167, %c1_i32_168 : i32
    %191 = arith.addi %189, %190 : i32
    %c1_i32_169 = arith.constant 1 : i32
    %192 = arith.divsi %191, %c1_i32_169 : i32
    %c1_i32_170 = arith.constant 1 : i32
    %c0_i32_171 = arith.constant 0 : i32
    %c0_i32_172 = arith.constant 0 : i32
    %193 = arith.subi %192, %c0_i32_172 : i32
    %194 = arith.addi %c0_i32_172, %193 : i32
    %c1_i32_173 = arith.constant 1 : i32
    scf.for %arg11 = %c0_i32_172 to %194 step %c1_i32_173  : i32 {
      %259 = arith.muli %arg11, %c1_i32_170 : i32
      %260 = arith.addi %c0_i32_171, %259 : i32
      %c4_i32_234 = arith.constant 4 : i32
      %c4_i32_235 = arith.constant 4 : i32
      %c0_i32_236 = arith.constant 0 : i32
      %c0_i32_237 = arith.constant 0 : i32
      %261 = tpu.memref_slice %arg5[%c0_i32_236, %c0_i32_237] : memref<64x128xf32, #tpu.memory_space<any>> -> memref<1x128xf32, #tpu.memory_space<any>>
      %c0_i32_238 = arith.constant 0 : i32
      %262 = tpu.memref_slice %arg7[%c4_i32_234, %260, %c0_i32_238] : memref<8x8x128xf32, #tpu.memory_space<vmem>> -> memref<1x1x128xf32, #tpu.memory_space<vmem>>
      %263 = tpu.memref_squeeze %262 : memref<1x1x128xf32, #tpu.memory_space<vmem>> -> memref<1x128xf32, #tpu.memory_space<vmem>>
      %264 = tpu.memref_slice %arg9[%c4_i32_235] : memref<8x!tpu.dma_semaphore, #tpu.memory_space<semaphore_mem>> -> memref<1x!tpu.dma_semaphore, #tpu.memory_space<semaphore_mem>>
      %265 = tpu.memref_squeeze %264 : memref<1x!tpu.dma_semaphore, #tpu.memory_space<semaphore_mem>> -> memref<!tpu.dma_semaphore, #tpu.memory_space<semaphore_mem>>
      tpu.wait_dma2 semaphore(%265 : memref<!tpu.dma_semaphore, #tpu.memory_space<semaphore_mem>>) src(%261 : memref<1x128xf32, #tpu.memory_space<any>>) dst(%263 : memref<1x128xf32, #tpu.memory_space<vmem>>)
    }
    %c4_i32_174 = arith.constant 4 : i32
    %c0_i32_175 = arith.constant 0 : i32
    %c0_i32_176 = arith.constant 0 : i32
    %195 = tpu.memref_slice %arg5[%c0_i32_175, %c0_i32_176] : memref<64x128xf32, #tpu.memory_space<any>> -> memref<1x128xf32, #tpu.memory_space<any>>
    %c4_i32_177 = arith.constant 4 : i32
    %c0_i32_178 = arith.constant 0 : i32
    %196 = tpu.memref_slice %arg8[%c4_i32_177, %c0_i32_178] : memref<8x128xf32, #tpu.memory_space<vmem>> -> memref<1x128xf32, #tpu.memory_space<vmem>>
    %197 = tpu.memref_slice %arg10[%c4_i32_174] : memref<8x!tpu.dma_semaphore, #tpu.memory_space<semaphore_mem>> -> memref<1x!tpu.dma_semaphore, #tpu.memory_space<semaphore_mem>>
    %198 = tpu.memref_squeeze %197 : memref<1x!tpu.dma_semaphore, #tpu.memory_space<semaphore_mem>> -> memref<!tpu.dma_semaphore, #tpu.memory_space<semaphore_mem>>
    tpu.wait_dma2 semaphore(%198 : memref<!tpu.dma_semaphore, #tpu.memory_space<semaphore_mem>>) src(%195 : memref<1x128xf32, #tpu.memory_space<any>>) dst(%196 : memref<1x128xf32, #tpu.memory_space<vmem>>)
    %c5_i32_179 = arith.constant 5 : i32
    %199 = arith.addi %0, %c5_i32_179 : i32
    %200 = arith.index_cast %199 : i32 to index
    %201 = memref.load %arg2[%200] : memref<8xi32, #tpu.memory_space<smem>>
    %c8_i32_180 = arith.constant 8 : i32
    %202 = arith.minsi %201, %c8_i32_180 : i32
    %c0_i32_181 = arith.constant 0 : i32
    %203 = arith.subi %202, %c0_i32_181 : i32
    %c1_i32_182 = arith.constant 1 : i32
    %c1_i32_183 = arith.constant 1 : i32
    %204 = arith.subi %c1_i32_182, %c1_i32_183 : i32
    %205 = arith.addi %203, %204 : i32
    %c1_i32_184 = arith.constant 1 : i32
    %206 = arith.divsi %205, %c1_i32_184 : i32
    %c1_i32_185 = arith.constant 1 : i32
    %c0_i32_186 = arith.constant 0 : i32
    %c0_i32_187 = arith.constant 0 : i32
    %207 = arith.subi %206, %c0_i32_187 : i32
    %208 = arith.addi %c0_i32_187, %207 : i32
    %c1_i32_188 = arith.constant 1 : i32
    scf.for %arg11 = %c0_i32_187 to %208 step %c1_i32_188  : i32 {
      %259 = arith.muli %arg11, %c1_i32_185 : i32
      %260 = arith.addi %c0_i32_186, %259 : i32
      %c5_i32_234 = arith.constant 5 : i32
      %c5_i32_235 = arith.constant 5 : i32
      %c0_i32_236 = arith.constant 0 : i32
      %c0_i32_237 = arith.constant 0 : i32
      %261 = tpu.memref_slice %arg5[%c0_i32_236, %c0_i32_237] : memref<64x128xf32, #tpu.memory_space<any>> -> memref<1x128xf32, #tpu.memory_space<any>>
      %c0_i32_238 = arith.constant 0 : i32
      %262 = tpu.memref_slice %arg7[%c5_i32_234, %260, %c0_i32_238] : memref<8x8x128xf32, #tpu.memory_space<vmem>> -> memref<1x1x128xf32, #tpu.memory_space<vmem>>
      %263 = tpu.memref_squeeze %262 : memref<1x1x128xf32, #tpu.memory_space<vmem>> -> memref<1x128xf32, #tpu.memory_space<vmem>>
      %264 = tpu.memref_slice %arg9[%c5_i32_235] : memref<8x!tpu.dma_semaphore, #tpu.memory_space<semaphore_mem>> -> memref<1x!tpu.dma_semaphore, #tpu.memory_space<semaphore_mem>>
      %265 = tpu.memref_squeeze %264 : memref<1x!tpu.dma_semaphore, #tpu.memory_space<semaphore_mem>> -> memref<!tpu.dma_semaphore, #tpu.memory_space<semaphore_mem>>
      tpu.wait_dma2 semaphore(%265 : memref<!tpu.dma_semaphore, #tpu.memory_space<semaphore_mem>>) src(%261 : memref<1x128xf32, #tpu.memory_space<any>>) dst(%263 : memref<1x128xf32, #tpu.memory_space<vmem>>)
    }
    %c5_i32_189 = arith.constant 5 : i32
    %c0_i32_190 = arith.constant 0 : i32
    %c0_i32_191 = arith.constant 0 : i32
    %209 = tpu.memref_slice %arg5[%c0_i32_190, %c0_i32_191] : memref<64x128xf32, #tpu.memory_space<any>> -> memref<1x128xf32, #tpu.memory_space<any>>
    %c5_i32_192 = arith.constant 5 : i32
    %c0_i32_193 = arith.constant 0 : i32
    %210 = tpu.memref_slice %arg8[%c5_i32_192, %c0_i32_193] : memref<8x128xf32, #tpu.memory_space<vmem>> -> memref<1x128xf32, #tpu.memory_space<vmem>>
    %211 = tpu.memref_slice %arg10[%c5_i32_189] : memref<8x!tpu.dma_semaphore, #tpu.memory_space<semaphore_mem>> -> memref<1x!tpu.dma_semaphore, #tpu.memory_space<semaphore_mem>>
    %212 = tpu.memref_squeeze %211 : memref<1x!tpu.dma_semaphore, #tpu.memory_space<semaphore_mem>> -> memref<!tpu.dma_semaphore, #tpu.memory_space<semaphore_mem>>
    tpu.wait_dma2 semaphore(%212 : memref<!tpu.dma_semaphore, #tpu.memory_space<semaphore_mem>>) src(%209 : memref<1x128xf32, #tpu.memory_space<any>>) dst(%210 : memref<1x128xf32, #tpu.memory_space<vmem>>)
    %c6_i32_194 = arith.constant 6 : i32
    %213 = arith.addi %0, %c6_i32_194 : i32
    %214 = arith.index_cast %213 : i32 to index
    %215 = memref.load %arg2[%214] : memref<8xi32, #tpu.memory_space<smem>>
    %c8_i32_195 = arith.constant 8 : i32
    %216 = arith.minsi %215, %c8_i32_195 : i32
    %c0_i32_196 = arith.constant 0 : i32
    %217 = arith.subi %216, %c0_i32_196 : i32
    %c1_i32_197 = arith.constant 1 : i32
    %c1_i32_198 = arith.constant 1 : i32
    %218 = arith.subi %c1_i32_197, %c1_i32_198 : i32
    %219 = arith.addi %217, %218 : i32
    %c1_i32_199 = arith.constant 1 : i32
    %220 = arith.divsi %219, %c1_i32_199 : i32
    %c1_i32_200 = arith.constant 1 : i32
    %c0_i32_201 = arith.constant 0 : i32
    %c0_i32_202 = arith.constant 0 : i32
    %221 = arith.subi %220, %c0_i32_202 : i32
    %222 = arith.addi %c0_i32_202, %221 : i32
    %c1_i32_203 = arith.constant 1 : i32
    scf.for %arg11 = %c0_i32_202 to %222 step %c1_i32_203  : i32 {
      %259 = arith.muli %arg11, %c1_i32_200 : i32
      %260 = arith.addi %c0_i32_201, %259 : i32
      %c6_i32_234 = arith.constant 6 : i32
      %c6_i32_235 = arith.constant 6 : i32
      %c0_i32_236 = arith.constant 0 : i32
      %c0_i32_237 = arith.constant 0 : i32
      %261 = tpu.memref_slice %arg5[%c0_i32_236, %c0_i32_237] : memref<64x128xf32, #tpu.memory_space<any>> -> memref<1x128xf32, #tpu.memory_space<any>>
      %c0_i32_238 = arith.constant 0 : i32
      %262 = tpu.memref_slice %arg7[%c6_i32_234, %260, %c0_i32_238] : memref<8x8x128xf32, #tpu.memory_space<vmem>> -> memref<1x1x128xf32, #tpu.memory_space<vmem>>
      %263 = tpu.memref_squeeze %262 : memref<1x1x128xf32, #tpu.memory_space<vmem>> -> memref<1x128xf32, #tpu.memory_space<vmem>>
      %264 = tpu.memref_slice %arg9[%c6_i32_235] : memref<8x!tpu.dma_semaphore, #tpu.memory_space<semaphore_mem>> -> memref<1x!tpu.dma_semaphore, #tpu.memory_space<semaphore_mem>>
      %265 = tpu.memref_squeeze %264 : memref<1x!tpu.dma_semaphore, #tpu.memory_space<semaphore_mem>> -> memref<!tpu.dma_semaphore, #tpu.memory_space<semaphore_mem>>
      tpu.wait_dma2 semaphore(%265 : memref<!tpu.dma_semaphore, #tpu.memory_space<semaphore_mem>>) src(%261 : memref<1x128xf32, #tpu.memory_space<any>>) dst(%263 : memref<1x128xf32, #tpu.memory_space<vmem>>)
    }
    %c6_i32_204 = arith.constant 6 : i32
    %c0_i32_205 = arith.constant 0 : i32
    %c0_i32_206 = arith.constant 0 : i32
    %223 = tpu.memref_slice %arg5[%c0_i32_205, %c0_i32_206] : memref<64x128xf32, #tpu.memory_space<any>> -> memref<1x128xf32, #tpu.memory_space<any>>
    %c6_i32_207 = arith.constant 6 : i32
    %c0_i32_208 = arith.constant 0 : i32
    %224 = tpu.memref_slice %arg8[%c6_i32_207, %c0_i32_208] : memref<8x128xf32, #tpu.memory_space<vmem>> -> memref<1x128xf32, #tpu.memory_space<vmem>>
    %225 = tpu.memref_slice %arg10[%c6_i32_204] : memref<8x!tpu.dma_semaphore, #tpu.memory_space<semaphore_mem>> -> memref<1x!tpu.dma_semaphore, #tpu.memory_space<semaphore_mem>>
    %226 = tpu.memref_squeeze %225 : memref<1x!tpu.dma_semaphore, #tpu.memory_space<semaphore_mem>> -> memref<!tpu.dma_semaphore, #tpu.memory_space<semaphore_mem>>
    tpu.wait_dma2 semaphore(%226 : memref<!tpu.dma_semaphore, #tpu.memory_space<semaphore_mem>>) src(%223 : memref<1x128xf32, #tpu.memory_space<any>>) dst(%224 : memref<1x128xf32, #tpu.memory_space<vmem>>)
    %c7_i32_209 = arith.constant 7 : i32
    %227 = arith.addi %0, %c7_i32_209 : i32
    %228 = arith.index_cast %227 : i32 to index
    %229 = memref.load %arg2[%228] : memref<8xi32, #tpu.memory_space<smem>>
    %c8_i32_210 = arith.constant 8 : i32
    %230 = arith.minsi %229, %c8_i32_210 : i32
    %c0_i32_211 = arith.constant 0 : i32
    %231 = arith.subi %230, %c0_i32_211 : i32
    %c1_i32_212 = arith.constant 1 : i32
    %c1_i32_213 = arith.constant 1 : i32
    %232 = arith.subi %c1_i32_212, %c1_i32_213 : i32
    %233 = arith.addi %231, %232 : i32
    %c1_i32_214 = arith.constant 1 : i32
    %234 = arith.divsi %233, %c1_i32_214 : i32
    %c1_i32_215 = arith.constant 1 : i32
    %c0_i32_216 = arith.constant 0 : i32
    %c0_i32_217 = arith.constant 0 : i32
    %235 = arith.subi %234, %c0_i32_217 : i32
    %236 = arith.addi %c0_i32_217, %235 : i32
    %c1_i32_218 = arith.constant 1 : i32
    scf.for %arg11 = %c0_i32_217 to %236 step %c1_i32_218  : i32 {
      %259 = arith.muli %arg11, %c1_i32_215 : i32
      %260 = arith.addi %c0_i32_216, %259 : i32
      %c7_i32_234 = arith.constant 7 : i32
      %c7_i32_235 = arith.constant 7 : i32
      %c0_i32_236 = arith.constant 0 : i32
      %c0_i32_237 = arith.constant 0 : i32
      %261 = tpu.memref_slice %arg5[%c0_i32_236, %c0_i32_237] : memref<64x128xf32, #tpu.memory_space<any>> -> memref<1x128xf32, #tpu.memory_space<any>>
      %c0_i32_238 = arith.constant 0 : i32
      %262 = tpu.memref_slice %arg7[%c7_i32_234, %260, %c0_i32_238] : memref<8x8x128xf32, #tpu.memory_space<vmem>> -> memref<1x1x128xf32, #tpu.memory_space<vmem>>
      %263 = tpu.memref_squeeze %262 : memref<1x1x128xf32, #tpu.memory_space<vmem>> -> memref<1x128xf32, #tpu.memory_space<vmem>>
      %264 = tpu.memref_slice %arg9[%c7_i32_235] : memref<8x!tpu.dma_semaphore, #tpu.memory_space<semaphore_mem>> -> memref<1x!tpu.dma_semaphore, #tpu.memory_space<semaphore_mem>>
      %265 = tpu.memref_squeeze %264 : memref<1x!tpu.dma_semaphore, #tpu.memory_space<semaphore_mem>> -> memref<!tpu.dma_semaphore, #tpu.memory_space<semaphore_mem>>
      tpu.wait_dma2 semaphore(%265 : memref<!tpu.dma_semaphore, #tpu.memory_space<semaphore_mem>>) src(%261 : memref<1x128xf32, #tpu.memory_space<any>>) dst(%263 : memref<1x128xf32, #tpu.memory_space<vmem>>)
    }
    %c7_i32_219 = arith.constant 7 : i32
    %c0_i32_220 = arith.constant 0 : i32
    %c0_i32_221 = arith.constant 0 : i32
    %237 = tpu.memref_slice %arg5[%c0_i32_220, %c0_i32_221] : memref<64x128xf32, #tpu.memory_space<any>> -> memref<1x128xf32, #tpu.memory_space<any>>
    %c7_i32_222 = arith.constant 7 : i32
    %c0_i32_223 = arith.constant 0 : i32
    %238 = tpu.memref_slice %arg8[%c7_i32_222, %c0_i32_223] : memref<8x128xf32, #tpu.memory_space<vmem>> -> memref<1x128xf32, #tpu.memory_space<vmem>>
    %239 = tpu.memref_slice %arg10[%c7_i32_219] : memref<8x!tpu.dma_semaphore, #tpu.memory_space<semaphore_mem>> -> memref<1x!tpu.dma_semaphore, #tpu.memory_space<semaphore_mem>>
    %240 = tpu.memref_squeeze %239 : memref<1x!tpu.dma_semaphore, #tpu.memory_space<semaphore_mem>> -> memref<!tpu.dma_semaphore, #tpu.memory_space<semaphore_mem>>
    tpu.wait_dma2 semaphore(%240 : memref<!tpu.dma_semaphore, #tpu.memory_space<semaphore_mem>>) src(%237 : memref<1x128xf32, #tpu.memory_space<any>>) dst(%238 : memref<1x128xf32, #tpu.memory_space<vmem>>)
    %c0 = arith.constant 0 : index
    %c0_224 = arith.constant 0 : index
    %241 = vector.load %arg4[%c0, %c0_224] : memref<8x1xi32, #tpu.memory_space<vmem>>, vector<8x1xi32>
    %242 = tpu.iota {dimensions = array<i32: 1>} : vector<8x8x128xi32>
    %243 = vector.shape_cast %241 : vector<8x1xi32> to vector<8x1x1xi32>
    %244 = vector.broadcast %243 : vector<8x1x1xi32> to vector<8x8x128xi32>
    %245 = arith.cmpi slt, %242, %244 : vector<8x8x128xi32>
    %c0_225 = arith.constant 0 : index
    %c0_226 = arith.constant 0 : index
    %c0_227 = arith.constant 0 : index
    %246 = vector.load %arg7[%c0_225, %c0_226, %c0_227] : memref<8x8x128xf32, #tpu.memory_space<vmem>>, vector<8x8x128xf32>
    %cst = arith.constant 0.000000e+00 : f32
    %247 = vector.broadcast %cst : f32 to vector<8x8x128xf32>
    %248 = arith.select %245, %246, %247 : vector<8x8x128xi1>, vector<8x8x128xf32>
    %cst_228 = arith.constant dense<0.000000e+00> : vector<8x128xf32>
    %249 = vector.multi_reduction <add>, %248, %cst_228 [1] : vector<8x8x128xf32> to vector<8x128xf32>
    %250 = arith.sitofp %241 : vector<8x1xi32> to vector<8x1xf32>
    %cst_229 = arith.constant 1.000000e+00 : f32
    %251 = vector.broadcast %cst_229 : f32 to vector<8x1xf32>
    %252 = arith.divf %251, %250 : vector<8x1xf32>
    %253 = vector.broadcast %252 : vector<8x1xf32> to vector<8x128xf32>
    %254 = arith.mulf %249, %253 : vector<8x128xf32>
    %c0_230 = arith.constant 0 : index
    %c0_231 = arith.constant 0 : index
    %255 = vector.load %arg8[%c0_230, %c0_231] : memref<8x128xf32, #tpu.memory_space<vmem>>, vector<8x128xf32>
    %256 = arith.subf %254, %255 : vector<8x128xf32>
    %257 = arith.mulf %256, %256 : vector<8x128xf32>
    %c0_232 = arith.constant 0 : index
    %c0_233 = arith.constant 0 : index
    %258 = vector.load %arg6[%c0_232, %c0_233] : memref<8x128xf32, #tpu.memory_space<vmem>>, vector<8x128xf32>
    tpu.vector_store %arg6[%c0_232, %c0_233], %257 {strides = array<i32>} : memref<8x128xf32, #tpu.memory_space<vmem>>, vector<8x128xf32>,
    return
  }
  func.func @transform_0(%arg0: i32, %arg1: memref<8x8xi32, #tpu.memory_space<smem>>, %arg2: memref<8xi32, #tpu.memory_space<smem>>, %arg3: memref<8xi32, #tpu.memory_space<smem>>) -> (i32, i32) {
    %c0_i32 = arith.constant 0 : i32
    %c0_i32_0 = arith.constant 0 : i32
    return %arg0, %c0_i32 : i32, i32
  }
  func.func @transform_2(%arg0: i32, %arg1: memref<8x8xi32, #tpu.memory_space<smem>>, %arg2: memref<8xi32, #tpu.memory_space<smem>>, %arg3: memref<8xi32, #tpu.memory_space<smem>>) -> (i32, i32) {
    %c0_i32 = arith.constant 0 : i32
    %c0_i32_0 = arith.constant 0 : i32
    return %arg0, %c0_i32 : i32, i32
  }
}

</mosaic_0001>

<bundles_post_ra>
// kernel: forward.1
= control target key start
LH: loop header
LB: loop body
LE: loop exit
PB: predicated region body
PF: predicated region fallthrough
CT: control target
= control target key end

     0   :  { %s1851_s24 = smov [#allocation7]   ;;  %s1852_s25 = smov [#allocation8]   ;;  %s2177_s0 = inlined_call_operand.vmem [shape: s32[8,8], index: 0, kind: input, shape index: {}]   ;;  %s2178_s3 = inlined_call_operand.vmem [shape: s32[8,1], index: 3, kind: input, shape index: {}]   ;;  %s2179_s4 = inlined_call_operand.hbm [shape: f32[64,128], index: 4, kind: input, shape index: {}]   ;;  %s2180_s5 = inlined_call_operand.vmem [shape: f32[8,128], index: 5, kind: output, shape index: {}]   ;;  %s2181_s1 = inlined_call_operand.vmem [shape: s32[8], index: 1, kind: input, shape index: {}]   ;;  %s2182_s2 = inlined_call_operand.vmem [shape: s32[8], index: 2, kind: input, shape index: {}]  }
   0x1   :  { %s11_s20 = sshll.u32 %s2177_s0, 4  ;;  %s16_s23 = sshll.u32 %s2181_s1, 4  ;;  %s12_s20 = int_to_ptr.vmem [resolvable:$true] %s11_s20  ;;  %s17_s23 = int_to_ptr.vmem [resolvable:$true] %s16_s23 }
   0x2   :  { %14 = dma.vmem_to_smem %s12_s20, 128, %s1851_s24, [#allocation6] }
   0x3   :  { %19 = dma.vmem_to_smem %s17_s23, 16, %s1852_s25, [#allocation6] }
   0x4   :  { %s21_s28 = sshll.u32 %s2182_s2, 4  ;;  %s1853_s29 = smov [#allocation9]   ;;  %s22_s28 = int_to_ptr.vmem [resolvable:$true] %s21_s28 }
   0x5   :  { %24 = dma.vmem_to_smem %s22_s28, 16, %s1853_s29, [#allocation6] }
   0x6   :  { %1753 = dma.done.wait [#allocation6], 160 }
   0x7   :  { %1754 = vsyncadd [#allocation6], 4294967136 }
   0x8   :  { %27 = sfence }
   0x9   :  { %s31_s0 = sld [smem:[#allocation8]]  ;;  %s1854_s6 = smov [#allocation3]  }
   0xa   :  { %s34_s30 = sld [smem:[#allocation9]]  ;;  %s45_s1 = sshll.u32 %s1854_s6, 4  ;;  %s46_s1 = int_to_ptr.vmem [resolvable:$true] %s45_s1 }
   0xb   :  { %s1918_s15 = scalar_lea.hbm %s2179_s4, 64 }
   0xf   :  { %p32_p0 = scmp.lt.s32.totalorder %s31_s0, 8 }
  0x10   :  { %s35_s9 = scalar_lea.hbm %s2179_s4, %s34_s30 }
  0x11   :  { %s1913_s10 = scalar_select %p32_p0, %s31_s0, 8 }
  0x12   :  { %s43_s11 = sshll.u32 %s35_s9, 4  ;;  %s44_s11 = int_to_ptr.hbm [resolvable:$true] %s43_s11 }
  0x13   :  { %s1305_s2 = sshra.s32 %s44_s11, 4  ;;  %s1306_s2 = int_to_ptr.hbm [resolvable:$true] %s1305_s2 }
  0x14   :  { %s1307_s12 = scalar_lea.hbm %s1306_s2, 1  ;;  %p1310_p2 = scmp.lt.s32.totalorder %s1306_s2, %s2179_s4 }
  0x15   :  { %p1308_p1 = scmp.ne.s32.totalorder %s1306_s2, %s1307_s12  ;;  %p1311_p3 = scmp.lt.s32.totalorder %s1918_s15, %s1307_s12 }
  0x17   :  { %p1312_p4 = por %p1311_p3, %p1310_p2 }
  0x19   :  { %p1313_p5 = pnand %p1312_p4, %p1308_p1 }
  0x1b   :  { %1316 = shalt.err (!%p1313_p5)  }
  0x1c   :  { %48 = dma.hbm_to_vmem [thread:$0]  %s44_s11, 16, %s46_s1, [#allocation5] }
  0x1d   :  { %p1062_p6 = scmp.le.s32.totalorder %s31_s0, 0 }
  0x1e   :  { %s1924_s18 = smov (!%p1062_p6), 0  }
  0x1f   :  { %923 = sbr.rel (%p1062_p6) target bundleno = 75 (0x4b), region = 260 }
  0x24 LB: > { %s55_s19 = sshra.s32 %s1789_s18, 7  ;;  %s60_s20 = sand.u32 127, %s1789_s18  ;;  %s1789_s18 = sphi %s1924_s18, %s52_s18  }
  0x25   : > { %s1002_s21 = sshll.u32 %s55_s19, 7  ;;  %s64_s24 = scalar_lea.vmem [#allocation2], %s1789_s18 }
  0x26   : > { %s61_s22 = sadd.s32 %s1002_s21, %s60_s20  ;;  %s74_s25 = sshll.u32 %s64_s24, 4  ;;  %s75_s25 = int_to_ptr.vmem [resolvable:$true] %s74_s25 }
  0x27   : > { %s62_s23 = sld [smem:[#allocation7 + %s61_s22]] }
  0x2d   : > { %s63_s28 = scalar_lea.hbm %s2179_s4, %s62_s23 }
  0x2e   : > { %s72_s29 = sshll.u32 %s63_s28, 4  ;;  %s73_s29 = int_to_ptr.hbm [resolvable:$true] %s72_s29 }
  0x2f   : > { %s1329_s0 = sshra.s32 %s73_s29, 4  ;;  %s1330_s0 = int_to_ptr.hbm [resolvable:$true] %s1329_s0 }
  0x30   : > { %s1331_s30 = scalar_lea.hbm %s1330_s0, 1  ;;  %p1334_p8 = scmp.lt.s32.totalorder %s1330_s0, %s2179_s4 }
  0x31   : > { %p1332_p7 = scmp.ne.s32.totalorder %s1330_s0, %s1331_s30  ;;  %p1335_p9 = scmp.lt.s32.totalorder %s1918_s15, %s1331_s30 }
  0x33   : > { %p1336_p10 = por %p1335_p9, %p1334_p8 }
  0x35   : > { %p1337_p11 = pnand %p1336_p10, %p1332_p7 }
  0x37   : > { %1340 = shalt.err (!%p1337_p11)  }
  0x38   : > { %s1341_s7 = sshra.s32 %s75_s25, 4  ;;  %s1855_s9 = smov [#allocation2]   ;;  %s1342_s7 = int_to_ptr.vmem [resolvable:$true] %s1341_s7 }
  0x39   : > { %s1343_s8 = scalar_lea.vmem %s1342_s7, 1  ;;  %s1345_s11 = scalar_lea.vmem %s1855_s9, 64 }
  0x3a   : > { %p1344_p12 = scmp.ne.s32.totalorder %s1342_s7, %s1343_s8  ;;  %p1346_p13 = scmp.lt.s32.totalorder %s1342_s7, [#allocation2] }
  0x3b   : > { %p1347_p0 = scmp.lt.s32.totalorder %s1345_s11, %s1343_s8 }
  0x3d   : > { %p1348_p1 = por %p1347_p0, %p1346_p13 }
  0x3f   : > { %p1349_p2 = pnand %p1348_p1, %p1344_p12 }
  0x41   : > { %1352 = shalt.err (!%p1349_p2)  }
  0x42   : > { %77 = dma.hbm_to_vmem [thread:$0]  %s73_s29, 16, %s75_s25, [#allocation4] }
  0x43   : > { %s52_s18 = sadd.s32 1, %s1789_s18  }
  0x44   : > { %p51_p3 = scmp.ge.s32.totalorder %s52_s18, %s1913_s10 }
  0x46   :  { %54 = sbr.rel (!%p51_p3) target bundleno = 36 (0x24), region = 266 }
  0x4b PF:  { %s1003_s2 = sld [smem:[#allocation8 + $0x1]]  ;;  %s1856_s13 = smov [#allocation3 + $0x1]  }
  0x4c   :  { %s1004_s12 = sld [smem:[#allocation9 + $0x1]]  ;;  %s95_s14 = sshll.u32 %s1856_s13, 4  ;;  %s96_s14 = int_to_ptr.vmem [resolvable:$true] %s95_s14 }
  0x51   :  { %p80_p4 = scmp.lt.s32.totalorder %s1003_s2, 8 }
  0x52   :  { %s83_s19 = scalar_lea.hbm %s2179_s4, %s1004_s12 }
  0x53   :  { %s1946_s20 = scalar_select %p80_p4, %s1003_s2, 8 }
  0x54   :  { %s93_s21 = sshll.u32 %s83_s19, 4  ;;  %s94_s21 = int_to_ptr.hbm [resolvable:$true] %s93_s21 }
  0x55   :  { %s1353_s22 = sshra.s32 %s94_s21, 4  ;;  %s1354_s22 = int_to_ptr.hbm [resolvable:$true] %s1353_s22 }
  0x56   :  { %s1355_s18 = scalar_lea.hbm %s1354_s22, 1  ;;  %p1358_p6 = scmp.lt.s32.totalorder %s1354_s22, %s2179_s4 }
  0x57   :  { %p1356_p5 = scmp.ne.s32.totalorder %s1354_s22, %s1355_s18  ;;  %p1359_p7 = scmp.lt.s32.totalorder %s1918_s15, %s1355_s18 }
  0x59   :  { %p1360_p8 = por %p1359_p7, %p1358_p6 }
  0x5b   :  { %p1361_p9 = pnand %p1360_p8, %p1356_p5 }
  0x5d   :  { %1364 = shalt.err (!%p1361_p9)  }
  0x5e   :  { %98 = dma.hbm_to_vmem [thread:$0]  %s94_s21, 16, %s96_s14, [#allocation5 + $0x1] }
  0x5f   :  { %p1065_p10 = scmp.le.s32.totalorder %s1003_s2, 0 }
  0x60   :  { %s1952_s24 = smov (!%p1065_p10), 0  }
  0x61   :  { %928 = sbr.rel (%p1065_p10) target bundleno = 142 (0x8e), region = 271 }
  0x66 LB: > { %s105_s25 = sshra.s32 %s1793_s24, 7  ;;  %s110_s26 = sand.u32 127, %s1793_s24  ;;  %s1793_s24 = sphi %s1952_s24, %s102_s24  }
  0x67   : > { %s1068_s27 = sshll.u32 %s105_s25, 7  ;;  %s895_s30 = scalar_lea.vmem [#allocation2], %s1793_s24 }
  0x68   : > { %s1069_s28 = sadd.s32 128, %s1068_s27  ;;  %s896_s6 = scalar_lea.vmem %s895_s30, 8 [#allocation2] }
  0x69   : > { %s111_s29 = sadd.s32 %s1069_s28, %s110_s26  ;;  %s126_s1 = sshll.u32 %s896_s6, 4  ;;  %s127_s1 = int_to_ptr.vmem [resolvable:$true] %s126_s1 }
  0x6a   : > { %s112_s0 = sld [smem:[#allocation7 + %s111_s29]] }
  0x70   : > { %s113_s9 = scalar_lea.hbm %s2179_s4, %s112_s0 }
  0x71   : > { %s124_s11 = sshll.u32 %s113_s9, 4  ;;  %s125_s11 = int_to_ptr.hbm [resolvable:$true] %s124_s11 }
  0x72   : > { %s1377_s2 = sshra.s32 %s125_s11, 4  ;;  %s1378_s2 = int_to_ptr.hbm [resolvable:$true] %s1377_s2 }
  0x73   : > { %s1379_s12 = scalar_lea.hbm %s1378_s2, 1  ;;  %p1382_p12 = scmp.lt.s32.totalorder %s1378_s2, %s2179_s4 }
  0x74   : > { %p1380_p11 = scmp.ne.s32.totalorder %s1378_s2, %s1379_s12  ;;  %p1383_p13 = scmp.lt.s32.totalorder %s1918_s15, %s1379_s12 }
  0x76   : > { %p1384_p0 = por %p1383_p13, %p1382_p12 }
  0x78   : > { %p1385_p1 = pnand %p1384_p0, %p1380_p11 }
  0x7a   : > { %1388 = shalt.err (!%p1385_p1)  }
  0x7b   : > { %s1389_s16 = sshra.s32 %s127_s1, 4  ;;  %s1857_s19 = smov [#allocation2]   ;;  %s1390_s16 = int_to_ptr.vmem [resolvable:$true] %s1389_s16 }
  0x7c   : > { %s1391_s17 = scalar_lea.vmem %s1390_s16, 1  ;;  %s1393_s21 = scalar_lea.vmem %s1857_s19, 64 }
  0x7d   : > { %p1392_p2 = scmp.ne.s32.totalorder %s1390_s16, %s1391_s17  ;;  %p1394_p3 = scmp.lt.s32.totalorder %s1390_s16, [#allocation2] }
  0x7e   : > { %p1395_p4 = scmp.lt.s32.totalorder %s1393_s21, %s1391_s17 }
  0x80   : > { %p1396_p5 = por %p1395_p4, %p1394_p3 }
  0x82   : > { %p1397_p6 = pnand %p1396_p5, %p1392_p2 }
  0x84   : > { %1400 = shalt.err (!%p1397_p6)  }
  0x85   : > { %129 = dma.hbm_to_vmem [thread:$0]  %s125_s11, 16, %s127_s1, [#allocation4 + $0x1] }
  0x86   : > { %s102_s24 = sadd.s32 1, %s1793_s24  }
  0x87   : > { %p101_p7 = scmp.ge.s32.totalorder %s102_s24, %s1946_s20 }
  0x89   :  { %104 = sbr.rel (!%p101_p7) target bundleno = 102 (0x66), region = 277 }
  0x8e PF:  { %s1007_s22 = sld [smem:[#allocation8 + $0x2]]  ;;  %s1858_s10 = smov [#allocation3 + $0x2]  }
  0x8f   :  { %s1008_s18 = sld [smem:[#allocation9 + $0x2]]  ;;  %s147_s23 = sshll.u32 %s1858_s10, 4  ;;  %s148_s23 = int_to_ptr.vmem [resolvable:$true] %s147_s23 }
  0x94   :  { %p132_p8 = scmp.lt.s32.totalorder %s1007_s22, 8 }
  0x95   :  { %s135_s27 = scalar_lea.hbm %s2179_s4, %s1008_s18 }
  0x96   :  { %s1974_s28 = scalar_select %p132_p8, %s1007_s22, 8 }
  0x97   :  { %s145_s29 = sshll.u32 %s135_s27, 4  ;;  %s146_s29 = int_to_ptr.hbm [resolvable:$true] %s145_s29 }
  0x98   :  { %s1401_s0 = sshra.s32 %s146_s29, 4  ;;  %s1402_s0 = int_to_ptr.hbm [resolvable:$true] %s1401_s0 }
  0x99   :  { %s1403_s24 = scalar_lea.hbm %s1402_s0, 1  ;;  %p1406_p10 = scmp.lt.s32.totalorder %s1402_s0, %s2179_s4 }
  0x9a   :  { %p1404_p9 = scmp.ne.s32.totalorder %s1402_s0, %s1403_s24  ;;  %p1407_p11 = scmp.lt.s32.totalorder %s1918_s15, %s1403_s24 }
  0x9c   :  { %p1408_p12 = por %p1407_p11, %p1406_p10 }
  0x9e   :  { %p1409_p13 = pnand %p1408_p12, %p1404_p9 }
  0xa0   :  { %1412 = shalt.err (!%p1409_p13)  }
  0xa1   :  { %150 = dma.hbm_to_vmem [thread:$0]  %s146_s29, 16, %s148_s23, [#allocation5 + $0x2] }
  0xa2   :  { %p1070_p0 = scmp.le.s32.totalorder %s1007_s22, 0 }
  0xa3   :  { %s1980_s6 = smov (!%p1070_p0), 0  }
  0xa4   :  { %933 = sbr.rel (%p1070_p0) target bundleno = 209 (0xd1), region = 282 }
  0xa9 LB: > { %s157_s1 = sshra.s32 %s1797_s6, 7  ;;  %s162_s7 = sand.u32 127, %s1797_s6  ;;  %s1797_s6 = sphi %s1980_s6, %s154_s6  }
  0xaa   : > { %s1073_s8 = sshll.u32 %s157_s1, 7  ;;  %s899_s12 = scalar_lea.vmem [#allocation2], %s1797_s6 }
  0xab   : > { %s1074_s9 = sadd.s32 256, %s1073_s8  ;;  %s900_s13 = scalar_lea.vmem %s899_s12, 16 [#allocation2] }
  0xac   : > { %s163_s11 = sadd.s32 %s1074_s9, %s162_s7  ;;  %s178_s14 = sshll.u32 %s900_s13, 4  ;;  %s179_s14 = int_to_ptr.vmem [resolvable:$true] %s178_s14 }
  0xad   : > { %s164_s2 = sld [smem:[#allocation7 + %s163_s11]] }
  0xb3   : > { %s165_s19 = scalar_lea.hbm %s2179_s4, %s164_s2 }
  0xb4   : > { %s176_s21 = sshll.u32 %s165_s19, 4  ;;  %s177_s21 = int_to_ptr.hbm [resolvable:$true] %s176_s21 }
  0xb5   : > { %s1425_s22 = sshra.s32 %s177_s21, 4  ;;  %s1426_s22 = int_to_ptr.hbm [resolvable:$true] %s1425_s22 }
  0xb6   : > { %s1427_s18 = scalar_lea.hbm %s1426_s22, 1  ;;  %p1430_p2 = scmp.lt.s32.totalorder %s1426_s22, %s2179_s4 }
  0xb7   : > { %p1428_p1 = scmp.ne.s32.totalorder %s1426_s22, %s1427_s18  ;;  %p1431_p3 = scmp.lt.s32.totalorder %s1918_s15, %s1427_s18 }
  0xb9   : > { %p1432_p4 = por %p1431_p3, %p1430_p2 }
  0xbb   : > { %p1433_p5 = pnand %p1432_p4, %p1428_p1 }
  0xbd   : > { %1436 = shalt.err (!%p1433_p5)  }
  0xbe   : > { %s1437_s25 = sshra.s32 %s179_s14, 4  ;;  %s1859_s27 = smov [#allocation2]   ;;  %s1438_s25 = int_to_ptr.vmem [resolvable:$true] %s1437_s25 }
  0xbf   : > { %s1439_s26 = scalar_lea.vmem %s1438_s25, 1  ;;  %s1441_s29 = scalar_lea.vmem %s1859_s27, 64 }
  0xc0   : > { %p1440_p6 = scmp.ne.s32.totalorder %s1438_s25, %s1439_s26  ;;  %p1442_p7 = scmp.lt.s32.totalorder %s1438_s25, [#allocation2] }
  0xc1   : > { %p1443_p8 = scmp.lt.s32.totalorder %s1441_s29, %s1439_s26 }
  0xc3   : > { %p1444_p9 = por %p1443_p8, %p1442_p7 }
  0xc5   : > { %p1445_p10 = pnand %p1444_p9, %p1440_p6 }
  0xc7   : > { %1448 = shalt.err (!%p1445_p10)  }
  0xc8   : > { %181 = dma.hbm_to_vmem [thread:$0]  %s177_s21, 16, %s179_s14, [#allocation4 + $0x2] }
  0xc9   : > { %s154_s6 = sadd.s32 1, %s1797_s6  }
  0xca   : > { %p153_p11 = scmp.ge.s32.totalorder %s154_s6, %s1974_s28 }
  0xcc   :  { %156 = sbr.rel (!%p153_p11) target bundleno = 169 (0xa9), region = 288 }
  0xd1 PF:  { %s1011_s0 = sld [smem:[#allocation8 + $0x3]]  ;;  %s1860_s20 = smov [#allocation3 + $0x3]  }
  0xd2   :  { %s1012_s24 = sld [smem:[#allocation9 + $0x3]]  ;;  %s199_s30 = sshll.u32 %s1860_s20, 4  ;;  %s200_s30 = int_to_ptr.vmem [resolvable:$true] %s199_s30 }
  0xd7   :  { %p184_p12 = scmp.lt.s32.totalorder %s1011_s0, 8 }
  0xd8   :  { %s187_s8 = scalar_lea.hbm %s2179_s4, %s1012_s24 }
  0xd9   :  { %s2002_s9 = scalar_select %p184_p12, %s1011_s0, 8 }
  0xda   :  { %s197_s11 = sshll.u32 %s187_s8, 4  ;;  %s198_s11 = int_to_ptr.hbm [resolvable:$true] %s197_s11 }
  0xdb   :  { %s1449_s2 = sshra.s32 %s198_s11, 4  ;;  %s1450_s2 = int_to_ptr.hbm [resolvable:$true] %s1449_s2 }
  0xdc   :  { %s1451_s6 = scalar_lea.hbm %s1450_s2, 1  ;;  %p1454_p0 = scmp.lt.s32.totalorder %s1450_s2, %s2179_s4 }
  0xdd   :  { %p1452_p13 = scmp.ne.s32.totalorder %s1450_s2, %s1451_s6  ;;  %p1455_p1 = scmp.lt.s32.totalorder %s1918_s15, %s1451_s6 }
  0xdf   :  { %p1456_p2 = por %p1455_p1, %p1454_p0 }
  0xe1   :  { %p1457_p3 = pnand %p1456_p2, %p1452_p13 }
  0xe3   :  { %1460 = shalt.err (!%p1457_p3)  }
  0xe4   :  { %202 = dma.hbm_to_vmem [thread:$0]  %s198_s11, 16, %s200_s30, [#allocation5 + $0x3] }
  0xe5   :  { %p1075_p4 = scmp.le.s32.totalorder %s1011_s0, 0 }
  0xe6   :  { %s2008_s13 = smov (!%p1075_p4), 0  }
  0xe7   :  { %938 = sbr.rel (%p1075_p4) target bundleno = 276 (0x114), region = 293 }
  0xec LB: > { %s209_s14 = sshra.s32 %s1801_s13, 7  ;;  %s214_s16 = sand.u32 127, %s1801_s13  ;;  %s1801_s13 = sphi %s2008_s13, %s206_s13  }
  0xed   : > { %s1078_s17 = sshll.u32 %s209_s14, 7  ;;  %s903_s18 = scalar_lea.vmem [#allocation2], %s1801_s13 }
  0xee   : > { %s1079_s19 = sadd.s32 384, %s1078_s17  ;;  %s904_s10 = scalar_lea.vmem %s903_s18, 24 [#allocation2] }
  0xef   : > { %s215_s21 = sadd.s32 %s1079_s19, %s214_s16  ;;  %s230_s23 = sshll.u32 %s904_s10, 4  ;;  %s231_s23 = int_to_ptr.vmem [resolvable:$true] %s230_s23 }
  0xf0   : > { %s216_s22 = sld [smem:[#allocation7 + %s215_s21]] }
  0xf6   : > { %s217_s27 = scalar_lea.hbm %s2179_s4, %s216_s22 }
  0xf7   : > { %s228_s29 = sshll.u32 %s217_s27, 4  ;;  %s229_s29 = int_to_ptr.hbm [resolvable:$true] %s228_s29 }
  0xf8   : > { %s1473_s0 = sshra.s32 %s229_s29, 4  ;;  %s1474_s0 = int_to_ptr.hbm [resolvable:$true] %s1473_s0 }
  0xf9   : > { %s1475_s24 = scalar_lea.hbm %s1474_s0, 1  ;;  %p1478_p6 = scmp.lt.s32.totalorder %s1474_s0, %s2179_s4 }
  0xfa   : > { %p1476_p5 = scmp.ne.s32.totalorder %s1474_s0, %s1475_s24  ;;  %p1479_p7 = scmp.lt.s32.totalorder %s1918_s15, %s1475_s24 }
  0xfc   : > { %p1480_p8 = por %p1479_p7, %p1478_p6 }
  0xfe   : > { %p1481_p9 = pnand %p1480_p8, %p1476_p5 }
 0x100   : > { %1484 = shalt.err (!%p1481_p9)  }
 0x101   : > { %s1485_s1 = sshra.s32 %s231_s23, 4  ;;  %s1861_s8 = smov [#allocation2]   ;;  %s1486_s1 = int_to_ptr.vmem [resolvable:$true] %s1485_s1 }
 0x102   : > { %s1487_s7 = scalar_lea.vmem %s1486_s1, 1  ;;  %s1489_s11 = scalar_lea.vmem %s1861_s8, 64 }
 0x103   : > { %p1488_p10 = scmp.ne.s32.totalorder %s1486_s1, %s1487_s7  ;;  %p1490_p11 = scmp.lt.s32.totalorder %s1486_s1, [#allocation2] }
 0x104   : > { %p1491_p12 = scmp.lt.s32.totalorder %s1489_s11, %s1487_s7 }
 0x106   : > { %p1492_p13 = por %p1491_p12, %p1490_p11 }
 0x108   : > { %p1493_p0 = pnand %p1492_p13, %p1488_p10 }
 0x10a   : > { %1496 = shalt.err (!%p1493_p0)  }
 0x10b   : > { %233 = dma.hbm_to_vmem [thread:$0]  %s229_s29, 16, %s231_s23, [#allocation4 + $0x3] }
 0x10c   : > { %s206_s13 = sadd.s32 1, %s1801_s13  }
 0x10d   : > { %p205_p1 = scmp.ge.s32.totalorder %s206_s13, %s2002_s9 }
 0x10f   :  { %208 = sbr.rel (!%p205_p1) target bundleno = 236 (0xec), region = 299 }
 0x114 PF:  { %s1015_s2 = sld [smem:[#allocation8 + $0x4]]  ;;  %s1862_s28 = smov [#allocation3 + $0x4]  }
 0x115   :  { %s1016_s6 = sld [smem:[#allocation9 + $0x4]]  ;;  %s251_s12 = sshll.u32 %s1862_s28, 4  ;;  %s252_s12 = int_to_ptr.vmem [resolvable:$true] %s251_s12 }
 0x11a   :  { %p236_p2 = scmp.lt.s32.totalorder %s1015_s2, 8 }
 0x11b   :  { %s239_s17 = scalar_lea.hbm %s2179_s4, %s1016_s6 }
 0x11c   :  { %s2030_s19 = scalar_select %p236_p2, %s1015_s2, 8 }
 0x11d   :  { %s249_s21 = sshll.u32 %s239_s17, 4  ;;  %s250_s21 = int_to_ptr.hbm [resolvable:$true] %s249_s21 }
 0x11e   :  { %s1497_s22 = sshra.s32 %s250_s21, 4  ;;  %s1498_s22 = int_to_ptr.hbm [resolvable:$true] %s1497_s22 }
 0x11f   :  { %s1499_s13 = scalar_lea.hbm %s1498_s22, 1  ;;  %p1502_p4 = scmp.lt.s32.totalorder %s1498_s22, %s2179_s4 }
 0x120   :  { %p1500_p3 = scmp.ne.s32.totalorder %s1498_s22, %s1499_s13  ;;  %p1503_p5 = scmp.lt.s32.totalorder %s1918_s15, %s1499_s13 }
 0x122   :  { %p1504_p6 = por %p1503_p5, %p1502_p4 }
 0x124   :  { %p1505_p7 = pnand %p1504_p6, %p1500_p3 }
 0x126   :  { %1508 = shalt.err (!%p1505_p7)  }
 0x127   :  { %254 = dma.hbm_to_vmem [thread:$0]  %s250_s21, 16, %s252_s12, [#allocation5 + $0x4] }
 0x128   :  { %p1080_p8 = scmp.le.s32.totalorder %s1015_s2, 0 }
 0x129   :  { %s2036_s10 = smov (!%p1080_p8), 0  }
 0x12a   :  { %943 = sbr.rel (%p1080_p8) target bundleno = 343 (0x157), region = 304 }
 0x12f LB: > { %s261_s23 = sshra.s32 %s1805_s10, 7  ;;  %s266_s25 = sand.u32 127, %s1805_s10  ;;  %s1805_s10 = sphi %s2036_s10, %s258_s10  }
 0x130   : > { %s1083_s26 = sshll.u32 %s261_s23, 7  ;;  %s907_s24 = scalar_lea.vmem [#allocation2], %s1805_s10 }
 0x131   : > { %s1084_s27 = sadd.s32 512, %s1083_s26  ;;  %s908_s20 = scalar_lea.vmem %s907_s24, 32 [#allocation2] }
 0x132   : > { %s267_s29 = sadd.s32 %s1084_s27, %s266_s25  ;;  %s282_s30 = sshll.u32 %s908_s20, 4  ;;  %s283_s30 = int_to_ptr.vmem [resolvable:$true] %s282_s30 }
 0x133   : > { %s268_s0 = sld [smem:[#allocation7 + %s267_s29]] }
 0x139   : > { %s269_s8 = scalar_lea.hbm %s2179_s4, %s268_s0 }
 0x13a   : > { %s280_s11 = sshll.u32 %s269_s8, 4  ;;  %s281_s11 = int_to_ptr.hbm [resolvable:$true] %s280_s11 }
 0x13b   : > { %s1521_s2 = sshra.s32 %s281_s11, 4  ;;  %s1522_s2 = int_to_ptr.hbm [resolvable:$true] %s1521_s2 }
 0x13c   : > { %s1523_s6 = scalar_lea.hbm %s1522_s2, 1  ;;  %p1526_p10 = scmp.lt.s32.totalorder %s1522_s2, %s2179_s4 }
 0x13d   : > { %p1524_p9 = scmp.ne.s32.totalorder %s1522_s2, %s1523_s6  ;;  %p1527_p11 = scmp.lt.s32.totalorder %s1918_s15, %s1523_s6 }
 0x13f   : > { %p1528_p12 = por %p1527_p11, %p1526_p10 }
 0x141   : > { %p1529_p13 = pnand %p1528_p12, %p1524_p9 }
 0x143   : > { %1532 = shalt.err (!%p1529_p13)  }
 0x144   : > { %s1533_s14 = sshra.s32 %s283_s30, 4  ;;  %s1863_s17 = smov [#allocation2]   ;;  %s1534_s14 = int_to_ptr.vmem [resolvable:$true] %s1533_s14 }
 0x145   : > { %s1535_s16 = scalar_lea.vmem %s1534_s14, 1  ;;  %s1537_s21 = scalar_lea.vmem %s1863_s17, 64 }
 0x146   : > { %p1536_p0 = scmp.ne.s32.totalorder %s1534_s14, %s1535_s16  ;;  %p1538_p1 = scmp.lt.s32.totalorder %s1534_s14, [#allocation2] }
 0x147   : > { %p1539_p2 = scmp.lt.s32.totalorder %s1537_s21, %s1535_s16 }
 0x149   : > { %p1540_p3 = por %p1539_p2, %p1538_p1 }
 0x14b   : > { %p1541_p4 = pnand %p1540_p3, %p1536_p0 }
 0x14d   : > { %1544 = shalt.err (!%p1541_p4)  }
 0x14e   : > { %285 = dma.hbm_to_vmem [thread:$0]  %s281_s11, 16, %s283_s30, [#allocation4 + $0x4] }
 0x14f   : > { %s258_s10 = sadd.s32 1, %s1805_s10  }
 0x150   : > { %p257_p5 = scmp.ge.s32.totalorder %s258_s10, %s2030_s19 }
 0x152   :  { %260 = sbr.rel (!%p257_p5) target bundleno = 303 (0x12f), region = 310 }
 0x157 PF:  { %s1019_s22 = sld [smem:[#allocation8 + $0x5]]  ;;  %s1864_s9 = smov [#allocation3 + $0x5]  }
 0x158   :  { %s1020_s13 = sld [smem:[#allocation9 + $0x5]]  ;;  %s303_s18 = sshll.u32 %s1864_s9, 4  ;;  %s304_s18 = int_to_ptr.vmem [resolvable:$true] %s303_s18 }
 0x15d   :  { %p288_p6 = scmp.lt.s32.totalorder %s1019_s22, 8 }
 0x15e   :  { %s291_s26 = scalar_lea.hbm %s2179_s4, %s1020_s13 }
 0x15f   :  { %s2058_s27 = scalar_select %p288_p6, %s1019_s22, 8 }
 0x160   :  { %s301_s29 = sshll.u32 %s291_s26, 4  ;;  %s302_s29 = int_to_ptr.hbm [resolvable:$true] %s301_s29 }
 0x161   :  { %s1545_s0 = sshra.s32 %s302_s29, 4  ;;  %s1546_s0 = int_to_ptr.hbm [resolvable:$true] %s1545_s0 }
 0x162   :  { %s1547_s10 = scalar_lea.hbm %s1546_s0, 1  ;;  %p1550_p8 = scmp.lt.s32.totalorder %s1546_s0, %s2179_s4 }
 0x163   :  { %p1548_p7 = scmp.ne.s32.totalorder %s1546_s0, %s1547_s10  ;;  %p1551_p9 = scmp.lt.s32.totalorder %s1918_s15, %s1547_s10 }
 0x165   :  { %p1552_p10 = por %p1551_p9, %p1550_p8 }
 0x167   :  { %p1553_p11 = pnand %p1552_p10, %p1548_p7 }
 0x169   :  { %1556 = shalt.err (!%p1553_p11)  }
 0x16a   :  { %306 = dma.hbm_to_vmem [thread:$0]  %s302_s29, 16, %s304_s18, [#allocation5 + $0x5] }
 0x16b   :  { %p1085_p12 = scmp.le.s32.totalorder %s1019_s22, 0 }
 0x16c   :  { %s2064_s20 = smov (!%p1085_p12), 0  }
 0x16d   :  { %948 = sbr.rel (%p1085_p12) target bundleno = 410 (0x19a), region = 315 }
 0x172 LB: > { %s313_s30 = sshra.s32 %s1809_s20, 7  ;;  %s318_s1 = sand.u32 127, %s1809_s20  ;;  %s1809_s20 = sphi %s2064_s20, %s310_s20  }
 0x173   : > { %s1088_s7 = sshll.u32 %s313_s30, 7  ;;  %s911_s6 = scalar_lea.vmem [#allocation2], %s1809_s20 }
 0x174   : > { %s1089_s8 = sadd.s32 640, %s1088_s7  ;;  %s912_s28 = scalar_lea.vmem %s911_s6, 40 [#allocation2] }
 0x175   : > { %s319_s11 = sadd.s32 %s1089_s8, %s318_s1  ;;  %s334_s12 = sshll.u32 %s912_s28, 4  ;;  %s335_s12 = int_to_ptr.vmem [resolvable:$true] %s334_s12 }
 0x176   : > { %s320_s2 = sld [smem:[#allocation7 + %s319_s11]] }
 0x17c   : > { %s321_s17 = scalar_lea.hbm %s2179_s4, %s320_s2 }
 0x17d   : > { %s332_s21 = sshll.u32 %s321_s17, 4  ;;  %s333_s21 = int_to_ptr.hbm [resolvable:$true] %s332_s21 }
 0x17e   : > { %s1569_s22 = sshra.s32 %s333_s21, 4  ;;  %s1570_s22 = int_to_ptr.hbm [resolvable:$true] %s1569_s22 }
 0x17f   : > { %s1571_s13 = scalar_lea.hbm %s1570_s22, 1  ;;  %p1574_p0 = scmp.lt.s32.totalorder %s1570_s22, %s2179_s4 }
 0x180   : > { %p1572_p13 = scmp.ne.s32.totalorder %s1570_s22, %s1571_s13  ;;  %p1575_p1 = scmp.lt.s32.totalorder %s1918_s15, %s1571_s13 }
 0x182   : > { %p1576_p2 = por %p1575_p1, %p1574_p0 }
 0x184   : > { %p1577_p3 = pnand %p1576_p2, %p1572_p13 }
 0x186   : > { %1580 = shalt.err (!%p1577_p3)  }
 0x187   : > { %s1581_s23 = sshra.s32 %s335_s12, 4  ;;  %s1865_s26 = smov [#allocation2]   ;;  %s1582_s23 = int_to_ptr.vmem [resolvable:$true] %s1581_s23 }
 0x188   : > { %s1583_s25 = scalar_lea.vmem %s1582_s23, 1  ;;  %s1585_s29 = scalar_lea.vmem %s1865_s26, 64 }
 0x189   : > { %p1584_p4 = scmp.ne.s32.totalorder %s1582_s23, %s1583_s25  ;;  %p1586_p5 = scmp.lt.s32.totalorder %s1582_s23, [#allocation2] }
 0x18a   : > { %p1587_p6 = scmp.lt.s32.totalorder %s1585_s29, %s1583_s25 }
 0x18c   : > { %p1588_p7 = por %p1587_p6, %p1586_p5 }
 0x18e   : > { %p1589_p8 = pnand %p1588_p7, %p1584_p4 }
 0x190   : > { %1592 = shalt.err (!%p1589_p8)  }
 0x191   : > { %337 = dma.hbm_to_vmem [thread:$0]  %s333_s21, 16, %s335_s12, [#allocation4 + $0x5] }
 0x192   : > { %s310_s20 = sadd.s32 1, %s1809_s20  }
 0x193   : > { %p309_p9 = scmp.ge.s32.totalorder %s310_s20, %s2058_s27 }
 0x195   :  { %312 = sbr.rel (!%p309_p9) target bundleno = 370 (0x172), region = 321 }
 0x19a PF:  { %s1023_s0 = sld [smem:[#allocation8 + $0x6]]  ;;  %s1866_s19 = smov [#allocation3 + $0x6]  }
 0x19b   :  { %s1024_s10 = sld [smem:[#allocation9 + $0x6]]  ;;  %s355_s24 = sshll.u32 %s1866_s19, 4  ;;  %s356_s24 = int_to_ptr.vmem [resolvable:$true] %s355_s24 }
 0x1a0   :  { %p340_p10 = scmp.lt.s32.totalorder %s1023_s0, 8 }
 0x1a1   :  { %s343_s7 = scalar_lea.hbm %s2179_s4, %s1024_s10 }
 0x1a2   :  { %s2086_s8 = scalar_select %p340_p10, %s1023_s0, 8 }
 0x1a3   :  { %s353_s11 = sshll.u32 %s343_s7, 4  ;;  %s354_s11 = int_to_ptr.hbm [resolvable:$true] %s353_s11 }
 0x1a4   :  { %s1593_s2 = sshra.s32 %s354_s11, 4  ;;  %s1594_s2 = int_to_ptr.hbm [resolvable:$true] %s1593_s2 }
 0x1a5   :  { %s1595_s20 = scalar_lea.hbm %s1594_s2, 1  ;;  %p1598_p12 = scmp.lt.s32.totalorder %s1594_s2, %s2179_s4 }
 0x1a6   :  { %p1596_p11 = scmp.ne.s32.totalorder %s1594_s2, %s1595_s20  ;;  %p1599_p13 = scmp.lt.s32.totalorder %s1918_s15, %s1595_s20 }
 0x1a8   :  { %p1600_p0 = por %p1599_p13, %p1598_p12 }
 0x1aa   :  { %p1601_p1 = pnand %p1600_p0, %p1596_p11 }
 0x1ac   :  { %1604 = shalt.err (!%p1601_p1)  }
 0x1ad   :  { %358 = dma.hbm_to_vmem [thread:$0]  %s354_s11, 16, %s356_s24, [#allocation5 + $0x6] }
 0x1ae   :  { %p1090_p2 = scmp.le.s32.totalorder %s1023_s0, 0 }
 0x1af   :  { %s2092_s28 = smov (!%p1090_p2), 0  }
 0x1b0   :  { %953 = sbr.rel (%p1090_p2) target bundleno = 477 (0x1dd), region = 326 }
 0x1b5 LB: > { %s365_s12 = sshra.s32 %s1813_s28, 7  ;;  %s370_s14 = sand.u32 127, %s1813_s28  ;;  %s1813_s28 = sphi %s2092_s28, %s362_s28  }
 0x1b6   : > { %s1093_s16 = sshll.u32 %s365_s12, 7  ;;  %s915_s13 = scalar_lea.vmem [#allocation2], %s1813_s28 }
 0x1b7   : > { %s1094_s17 = sadd.s32 768, %s1093_s16  ;;  %s916_s9 = scalar_lea.vmem %s915_s13, 48 [#allocation2] }
 0x1b8   : > { %s371_s21 = sadd.s32 %s1094_s17, %s370_s14  ;;  %s386_s18 = sshll.u32 %s916_s9, 4  ;;  %s387_s18 = int_to_ptr.vmem [resolvable:$true] %s386_s18 }
 0x1b9   : > { %s372_s22 = sld [smem:[#allocation7 + %s371_s21]] }
 0x1bf   : > { %s373_s26 = scalar_lea.hbm %s2179_s4, %s372_s22 }
 0x1c0   : > { %s384_s29 = sshll.u32 %s373_s26, 4  ;;  %s385_s29 = int_to_ptr.hbm [resolvable:$true] %s384_s29 }
 0x1c1   : > { %s1617_s0 = sshra.s32 %s385_s29, 4  ;;  %s1618_s0 = int_to_ptr.hbm [resolvable:$true] %s1617_s0 }
 0x1c2   : > { %s1619_s10 = scalar_lea.hbm %s1618_s0, 1  ;;  %p1622_p4 = scmp.lt.s32.totalorder %s1618_s0, %s2179_s4 }
 0x1c3   : > { %p1620_p3 = scmp.ne.s32.totalorder %s1618_s0, %s1619_s10  ;;  %p1623_p5 = scmp.lt.s32.totalorder %s1918_s15, %s1619_s10 }
 0x1c5   : > { %p1624_p6 = por %p1623_p5, %p1622_p4 }
 0x1c7   : > { %p1625_p7 = pnand %p1624_p6, %p1620_p3 }
 0x1c9   : > { %1628 = shalt.err (!%p1625_p7)  }
 0x1ca   : > { %s1629_s30 = sshra.s32 %s387_s18, 4  ;;  %s1867_s7 = smov [#allocation2]   ;;  %s1630_s30 = int_to_ptr.vmem [resolvable:$true] %s1629_s30 }
 0x1cb   : > { %s1631_s1 = scalar_lea.vmem %s1630_s30, 1  ;;  %s1633_s11 = scalar_lea.vmem %s1867_s7, 64 }
 0x1cc   : > { %p1632_p8 = scmp.ne.s32.totalorder %s1630_s30, %s1631_s1  ;;  %p1634_p9 = scmp.lt.s32.totalorder %s1630_s30, [#allocation2] }
 0x1cd   : > { %p1635_p10 = scmp.lt.s32.totalorder %s1633_s11, %s1631_s1 }
 0x1cf   : > { %p1636_p11 = por %p1635_p10, %p1634_p9 }
 0x1d1   : > { %p1637_p12 = pnand %p1636_p11, %p1632_p8 }
 0x1d3   : > { %1640 = shalt.err (!%p1637_p12)  }
 0x1d4   : > { %389 = dma.hbm_to_vmem [thread:$0]  %s385_s29, 16, %s387_s18, [#allocation4 + $0x6] }
 0x1d5   : > { %s362_s28 = sadd.s32 1, %s1813_s28  }
 0x1d6   : > { %p361_p13 = scmp.ge.s32.totalorder %s362_s28, %s2086_s8 }
 0x1d8   :  { %364 = sbr.rel (!%p361_p13) target bundleno = 437 (0x1b5), region = 332 }
 0x1dd PF:  { %s1027_s2 = sld [smem:[#allocation8 + $0x7]]  ;;  %s1868_s27 = smov [#allocation3 + $0x7]  }
 0x1de   :  { %s1028_s20 = sld [smem:[#allocation9 + $0x7]]  ;;  %s407_s6 = sshll.u32 %s1868_s27, 4  ;;  %s408_s6 = int_to_ptr.vmem [resolvable:$true] %s407_s6 }
 0x1e3   :  { %p392_p0 = scmp.lt.s32.totalorder %s1027_s2, 8 }
 0x1e4   :  { %s395_s16 = scalar_lea.hbm %s2179_s4, %s1028_s20 }
 0x1e5   :  { %s2114_s17 = scalar_select %p392_p0, %s1027_s2, 8 }
 0x1e6   :  { %s405_s21 = sshll.u32 %s395_s16, 4  ;;  %s406_s21 = int_to_ptr.hbm [resolvable:$true] %s405_s21 }
 0x1e7   :  { %s1641_s22 = sshra.s32 %s406_s21, 4  ;;  %s1642_s22 = int_to_ptr.hbm [resolvable:$true] %s1641_s22 }
 0x1e8   :  { %s1643_s28 = scalar_lea.hbm %s1642_s22, 1  ;;  %p1646_p2 = scmp.lt.s32.totalorder %s1642_s22, %s2179_s4 }
 0x1e9   :  { %p1644_p1 = scmp.ne.s32.totalorder %s1642_s22, %s1643_s28  ;;  %p1647_p3 = scmp.lt.s32.totalorder %s1918_s15, %s1643_s28 }
 0x1eb   :  { %p1648_p4 = por %p1647_p3, %p1646_p2 }
 0x1ed   :  { %p1649_p5 = pnand %p1648_p4, %p1644_p1 }
 0x1ef   :  { %1652 = shalt.err (!%p1649_p5)  }
 0x1f0   :  { %410 = dma.hbm_to_vmem [thread:$0]  %s406_s21, 16, %s408_s6, [#allocation5 + $0x7] }
 0x1f1   :  { %p1095_p6 = scmp.le.s32.totalorder %s1027_s2, 0 }
 0x1f2   :  { %s2120_s9 = smov (!%p1095_p6), 0  }
 0x1f3   :  { %958 = sbr.rel (%p1095_p6) target bundleno = 544 (0x220), region = 337 }
 0x1f8 LB: > { %s417_s18 = sshra.s32 %s1817_s9, 7  ;;  %s422_s23 = sand.u32 127, %s1817_s9  ;;  %s1817_s9 = sphi %s2120_s9, %s414_s9  }
 0x1f9   : > { %s1098_s25 = sshll.u32 %s417_s18, 7  ;;  %s919_s10 = scalar_lea.vmem [#allocation2], %s1817_s9 }
 0x1fa   : > { %s1099_s26 = sadd.s32 896, %s1098_s25  ;;  %s920_s19 = scalar_lea.vmem %s919_s10, 56 [#allocation2] }
 0x1fb   : > { %s423_s29 = sadd.s32 %s1099_s26, %s422_s23  ;;  %s438_s24 = sshll.u32 %s920_s19, 4  ;;  %s439_s24 = int_to_ptr.vmem [resolvable:$true] %s438_s24 }
 0x1fc   : > { %s424_s0 = sld [smem:[#allocation7 + %s423_s29]] }
 0x202   : > { %s425_s7 = scalar_lea.hbm %s2179_s4, %s424_s0 }
 0x203   : > { %s436_s11 = sshll.u32 %s425_s7, 4  ;;  %s437_s11 = int_to_ptr.hbm [resolvable:$true] %s436_s11 }
 0x204   : > { %s1665_s2 = sshra.s32 %s437_s11, 4  ;;  %s1666_s2 = int_to_ptr.hbm [resolvable:$true] %s1665_s2 }
 0x205   : > { %s1667_s20 = scalar_lea.hbm %s1666_s2, 1  ;;  %p1670_p8 = scmp.lt.s32.totalorder %s1666_s2, %s2179_s4 }
 0x206   : > { %p1668_p7 = scmp.ne.s32.totalorder %s1666_s2, %s1667_s20  ;;  %p1671_p9 = scmp.lt.s32.totalorder %s1918_s15, %s1667_s20 }
 0x208   : > { %p1672_p10 = por %p1671_p9, %p1670_p8 }
 0x20a   : > { %p1673_p11 = pnand %p1672_p10, %p1668_p7 }
 0x20c   : > { %1676 = shalt.err (!%p1673_p11)  }
 0x20d   : > { %s1677_s12 = sshra.s32 %s439_s24, 4  ;;  %s1869_s16 = smov [#allocation2]   ;;  %s1678_s12 = int_to_ptr.vmem [resolvable:$true] %s1677_s12 }
 0x20e   : > { %s1679_s14 = scalar_lea.vmem %s1678_s12, 1  ;;  %s1681_s21 = scalar_lea.vmem %s1869_s16, 64 }
 0x20f   : > { %p1680_p12 = scmp.ne.s32.totalorder %s1678_s12, %s1679_s14  ;;  %p1682_p13 = scmp.lt.s32.totalorder %s1678_s12, [#allocation2] }
 0x210   : > { %p1683_p0 = scmp.lt.s32.totalorder %s1681_s21, %s1679_s14 }
 0x212   : > { %p1684_p1 = por %p1683_p0, %p1682_p13 }
 0x214   : > { %p1685_p2 = pnand %p1684_p1, %p1680_p12 }
 0x216   : > { %1688 = shalt.err (!%p1685_p2)  }
 0x217   : > { %441 = dma.hbm_to_vmem [thread:$0]  %s437_s11, 16, %s439_s24, [#allocation4 + $0x7] }
 0x218   : > { %s414_s9 = sadd.s32 1, %s1817_s9  }
 0x219   : > { %p413_p3 = scmp.ge.s32.totalorder %s414_s9, %s2114_s17 }
 0x21b   :  { %416 = sbr.rel (!%p413_p3) target bundleno = 504 (0x1f8), region = 343 }
 0x220 PF:  { %s442_s22 = sld [smem:[#allocation8]] }
 0x226   :  { %p443_p4 = scmp.lt.s32.totalorder %s442_s22, 8  ;;  %p1100_p5 = scmp.le.s32.totalorder %s442_s22, 0 }
 0x227   :  { %s1819_s8 = smov (!%p1100_p5), 0  }
 0x228   :  { %s444_s28 = scalar_select %p443_p4, %s442_s22, 8 }
 0x229   :  { %963 = sbr.rel (%p1100_p5) target bundleno = 567 (0x237), region = 348 }
 0x22e LB: > { %1755 = dma.done.wait [#allocation4], 16  ;;  %s1821_s8 = sphi %s1819_s8, %s448_s8  }
 0x22f   : > { %1756 = vsyncadd [#allocation4], 4294967280  ;;  %s448_s8 = sadd.s32 1, %s1821_s8  }
 0x230   : > { %p447_p6 = scmp.ge.s32.totalorder %s448_s8, %s444_s28 }
 0x232   :  { %450 = sbr.rel (!%p447_p6) target bundleno = 558 (0x22e), region = 354 }
 0x237 PF:  { %1757 = dma.done.wait [#allocation5], 16 }
 0x238   :  { %1758 = vsyncadd [#allocation5], 4294967280  ;;  %s1032_s13 = sld [smem:[#allocation8 + $0x1]] }
 0x23e   :  { %p458_p7 = scmp.lt.s32.totalorder %s1032_s13, 8  ;;  %p1103_p8 = scmp.le.s32.totalorder %s1032_s13, 0 }
 0x23f   :  { %s1823_s15 = smov (!%p1103_p8), 0  }
 0x240   :  { %s459_s4 = scalar_select %p458_p7, %s1032_s13, 8 }
 0x241   :  { %968 = sbr.rel (%p1103_p8) target bundleno = 591 (0x24f), region = 359 }
 0x246 LB: > { %1759 = dma.done.wait [#allocation4 + $0x1], 16  ;;  %s1825_s15 = sphi %s1823_s15, %s463_s15  }
 0x247   : > { %1760 = vsyncadd [#allocation4 + $0x1], 4294967280  ;;  %s463_s15 = sadd.s32 1, %s1825_s15  }
 0x248   : > { %p462_p9 = scmp.ge.s32.totalorder %s463_s15, %s459_s4 }
 0x24a   :  { %465 = sbr.rel (!%p462_p9) target bundleno = 582 (0x246), region = 365 }
 0x24f PF:  { %1761 = dma.done.wait [#allocation5 + $0x1], 16 }
 0x250   :  { %1762 = vsyncadd [#allocation5 + $0x1], 4294967280  ;;  %s1034_s17 = sld [smem:[#allocation8 + $0x2]] }
 0x256   :  { %p472_p10 = scmp.lt.s32.totalorder %s1034_s17, 8  ;;  %p1106_p11 = scmp.le.s32.totalorder %s1034_s17, 0 }
 0x257   :  { %s1827_s18 = smov (!%p1106_p11), 0  }
 0x258   :  { %s473_s9 = scalar_select %p472_p10, %s1034_s17, 8 }
 0x259   :  { %973 = sbr.rel (%p1106_p11) target bundleno = 615 (0x267), region = 370 }
 0x25e LB: > { %1763 = dma.done.wait [#allocation4 + $0x2], 16  ;;  %s1829_s18 = sphi %s1827_s18, %s477_s18  }
 0x25f   : > { %1764 = vsyncadd [#allocation4 + $0x2], 4294967280  ;;  %s477_s18 = sadd.s32 1, %s1829_s18  }
 0x260   : > { %p476_p12 = scmp.ge.s32.totalorder %s477_s18, %s473_s9 }
 0x262   :  { %479 = sbr.rel (!%p476_p12) target bundleno = 606 (0x25e), region = 376 }
 0x267 PF:  { %1765 = dma.done.wait [#allocation5 + $0x2], 16 }
 0x268   :  { %1766 = vsyncadd [#allocation5 + $0x2], 4294967280  ;;  %s1036_s23 = sld [smem:[#allocation8 + $0x3]] }
 0x26e   :  { %p486_p13 = scmp.lt.s32.totalorder %s1036_s23, 8  ;;  %p1109_p0 = scmp.le.s32.totalorder %s1036_s23, 0 }
 0x26f   :  { %s1831_s26 = smov (!%p1109_p0), 0  }
 0x270   :  { %s487_s25 = scalar_select %p486_p13, %s1036_s23, 8 }
 0x271   :  { %978 = sbr.rel (%p1109_p0) target bundleno = 639 (0x27f), region = 381 }
 0x276 LB: > { %1767 = dma.done.wait [#allocation4 + $0x3], 16  ;;  %s1833_s26 = sphi %s1831_s26, %s491_s26  }
 0x277   : > { %1768 = vsyncadd [#allocation4 + $0x3], 4294967280  ;;  %s491_s26 = sadd.s32 1, %s1833_s26  }
 0x278   : > { %p490_p1 = scmp.ge.s32.totalorder %s491_s26, %s487_s25 }
 0x27a   :  { %493 = sbr.rel (!%p490_p1) target bundleno = 630 (0x276), region = 387 }
 0x27f PF:  { %1769 = dma.done.wait [#allocation5 + $0x3], 16 }
 0x280   :  { %1770 = vsyncadd [#allocation5 + $0x3], 4294967280  ;;  %s1038_s29 = sld [smem:[#allocation8 + $0x4]] }
 0x286   :  { %p500_p2 = scmp.lt.s32.totalorder %s1038_s29, 8  ;;  %p1112_p3 = scmp.le.s32.totalorder %s1038_s29, 0 }
 0x287   :  { %s1835_s10 = smov (!%p1112_p3), 0  }
 0x288   :  { %s501_s0 = scalar_select %p500_p2, %s1038_s29, 8 }
 0x289   :  { %983 = sbr.rel (%p1112_p3) target bundleno = 663 (0x297), region = 392 }
 0x28e LB: > { %1771 = dma.done.wait [#allocation4 + $0x4], 16  ;;  %s1837_s10 = sphi %s1835_s10, %s505_s10  }
 0x28f   : > { %1772 = vsyncadd [#allocation4 + $0x4], 4294967280  ;;  %s505_s10 = sadd.s32 1, %s1837_s10  }
 0x290   : > { %p504_p4 = scmp.ge.s32.totalorder %s505_s10, %s501_s0 }
 0x292   :  { %507 = sbr.rel (!%p504_p4) target bundleno = 654 (0x28e), region = 398 }
 0x297 PF:  { %1773 = dma.done.wait [#allocation5 + $0x4], 16 }
 0x298   :  { %1774 = vsyncadd [#allocation5 + $0x4], 4294967280  ;;  %s1040_s19 = sld [smem:[#allocation8 + $0x5]] }
 0x29e   :  { %p514_p5 = scmp.lt.s32.totalorder %s1040_s19, 8  ;;  %p1115_p6 = scmp.le.s32.totalorder %s1040_s19, 0 }
 0x29f   :  { %s1839_s30 = smov (!%p1115_p6), 0  }
 0x2a0   :  { %s515_s24 = scalar_select %p514_p5, %s1040_s19, 8 }
 0x2a1   :  { %988 = sbr.rel (%p1115_p6) target bundleno = 687 (0x2af), region = 403 }
 0x2a6 LB: > { %1775 = dma.done.wait [#allocation4 + $0x5], 16  ;;  %s1841_s30 = sphi %s1839_s30, %s519_s30  }
 0x2a7   : > { %1776 = vsyncadd [#allocation4 + $0x5], 4294967280  ;;  %s519_s30 = sadd.s32 1, %s1841_s30  }
 0x2a8   : > { %p518_p7 = scmp.ge.s32.totalorder %s519_s30, %s515_s24 }
 0x2aa   :  { %521 = sbr.rel (!%p518_p7) target bundleno = 678 (0x2a6), region = 409 }
 0x2af PF:  { %1777 = dma.done.wait [#allocation5 + $0x5], 16 }
 0x2b0   :  { %1778 = vsyncadd [#allocation5 + $0x5], 4294967280  ;;  %s1042_s1 = sld [smem:[#allocation8 + $0x6]] }
 0x2b6   :  { %p528_p8 = scmp.lt.s32.totalorder %s1042_s1, 8  ;;  %p1118_p9 = scmp.le.s32.totalorder %s1042_s1, 0 }
 0x2b7   :  { %s1843_s11 = smov (!%p1118_p9), 0  }
 0x2b8   :  { %s529_s7 = scalar_select %p528_p8, %s1042_s1, 8 }
 0x2b9   :  { %993 = sbr.rel (%p1118_p9) target bundleno = 711 (0x2c7), region = 414 }
 0x2be LB: > { %1779 = dma.done.wait [#allocation4 + $0x6], 16  ;;  %s1845_s11 = sphi %s1843_s11, %s533_s11  }
 0x2bf   : > { %1780 = vsyncadd [#allocation4 + $0x6], 4294967280  ;;  %s533_s11 = sadd.s32 1, %s1845_s11  }
 0x2c0   : > { %p532_p10 = scmp.ge.s32.totalorder %s533_s11, %s529_s7 }
 0x2c2   :  { %535 = sbr.rel (!%p532_p10) target bundleno = 702 (0x2be), region = 420 }
 0x2c7 PF:  { %1781 = dma.done.wait [#allocation5 + $0x6], 16 }
 0x2c8   :  { %1782 = vsyncadd [#allocation5 + $0x6], 4294967280  ;;  %s1044_s2 = sld [smem:[#allocation8 + $0x7]] }
 0x2ce   :  { %p542_p11 = scmp.lt.s32.totalorder %s1044_s2, 8  ;;  %p1121_p12 = scmp.le.s32.totalorder %s1044_s2, 0 }
 0x2cf   :  { %s1847_s27 = smov (!%p1121_p12), 0  }
 0x2d0   :  { %s543_s20 = scalar_select %p542_p11, %s1044_s2, 8 }
 0x2d1   :  { %998 = sbr.rel (%p1121_p12) target bundleno = 735 (0x2df), region = 425 }
 0x2d6 LB: > { %1783 = dma.done.wait [#allocation4 + $0x7], 16  ;;  %s1849_s27 = sphi %s1847_s27, %s547_s27  }
 0x2d7   : > { %1784 = vsyncadd [#allocation4 + $0x7], 4294967280  ;;  %s547_s27 = sadd.s32 1, %s1849_s27  }
 0x2d8   : > { %p546_p13 = scmp.ge.s32.totalorder %s547_s27, %s543_s20 }
 0x2da   :  { %549 = sbr.rel (!%p546_p13) target bundleno = 726 (0x2d6), region = 431 }
 0x2df PF:  { %1785 = dma.done.wait [#allocation5 + $0x7], 16 }
 0x2e0   :  { %1786 = vsyncadd [#allocation5 + $0x7], 4294967280  ;;  %v1870_v0 = vmov 0   ;;  %v555_v1 = vld [vmem:[%s2178_s3] sm:$0xff]  ;;  %v556_v28 = vlaneseq  ;;  %v610_v35 = vld [vmem:[#allocation2 + $0x28] sm:$0xff]  ;;  %vm754_vm12 = vcmask 1041409  }
 0x2e1   :  { %1264 = vset.pattern.permute.xlu1 %v1870_v0  ;;  %1265 = vset.pattern.permute.xlu0 %v1870_v0  ;;  %v565_v2 = vperm.slane %v555_v1, 0  ;;  %v558_v3 = vrot.slane %v555_v1, 1  ;;  %v561_v4 = vrot.slane %v555_v1, 4  ;;  %v560_v6 = vrot.slane %v555_v1, 3  ;;  %v609_v31 = vld [vmem:[#allocation2 + $0x20] sm:$0xff]  ;;  %v606_v39 = vld [vmem:[#allocation2 + $0x8] sm:$0xff] }
 0x2e2   :  { %1266 = vset.pattern.permute.xlu2 %v1870_v0  ;;  %v669_v7 = vcvt.s32.f32 %v555_v1  ;;  %v559_v9 = vrot.slane %v555_v1, 2  ;;  %v562_v10 = vrot.slane %v555_v1, 5  ;;  %v564_v15 = vrot.slane %v555_v1, 7  ;;  %v605_v36 = vld [vmem:[#allocation2] sm:$0xff]  ;;  %v608_v51 = vld [vmem:[#allocation2 + $0x18] sm:$0xff]  ;;  %v607_v55 = vld [vmem:[#allocation2 + $0x10] sm:$0xff] }
 0x2e3   :  { %574 = vperm.xlu1 %1264, %v565_v2   ;;  %v566_v5 = vperm.slane %v558_v3, 0  ;;  %v569_v8 = vperm.slane %v561_v4, 0  ;;  %v568_v11 = vperm.slane %v560_v6, 0  ;;  %v563_v17 = vrot.slane %v555_v1, 6 }
 0x2e4   :  { %1267 = vrcp.f32 %v669_v7  ;;  %v567_v12 = vperm.slane %v559_v9, 0  ;;  %v570_v13 = vperm.slane %v562_v10, 0  ;;  %v681_v18 = vand.u32 2147483648, %v669_v7 }
 0x2e5   :  { %577 = vperm.xlu0 %1265, %v566_v5   ;;  %586 = vperm.xlu2 %1266, %v569_v8   ;;  %vm675_vm0 = vweird.f32 %v669_v7  ;;  %v679_v20 = vand.u32 2147483647, %v669_v7  ;;  %v572_v21 = vperm.slane %v564_v15, 0  ;;  %v571_v23 = vperm.slane %v563_v17, 0  ;;  %v612_v17 = vld [vmem:[#allocation2 + $0x38] sm:$0xff] }
 0x2e6   :  { %v682_v24 = vor.u32 1.1754944e-38, %v681_v18  ;;  %v2142_v30 = vshrl.u32 %v556_v28, 7  ;;  %vm757_vm13 = vcmask 1042434   ;;  %vm760_vm14 = vcmask 1043459  }
 0x2e7   :  { %vm680_vm3 = vcmp.eq.f32.partialorder %v679_v20, 8.507059e+37  ;;  %vm763_vm15 = vcmask 1044484  }
 0x2ea   :  { %v1268_v14 = vpop.eup %1267 }
 0x2eb   :  { %583 = vperm.xlu1 %1264, %v568_v11   ;;  %v671_v16 = vmul.f32 %v1268_v14, %v669_v7  ;;  %vm676_vm1 = vweird.f32 %v1268_v14  ;;  %v2153_v11 = vld [vmem:[#allocation3] sm:$0xff] }
 0x2ec   :  { %vm677_vm2 = vmor %vm675_vm0, %vm676_vm1  ;;  %v716_v18 = vrot.slane %v2153_v11, 3  ;;  %vm766_vm0 = vcmask 1045509   ;;  %vm769_vm1 = vcmask 1046534  }
 0x2ed   :  { %580 = vperm.xlu0 %1265, %v567_v12   ;;  %589 = vperm.xlu2 %1266, %v570_v13   ;;  %v672_v19 = vsub.f32 1.0, %v671_v16 }
 0x2ef   :  { %v673_v22 = vmul.f32 %v1268_v14, %v672_v19 }
 0x2f1   :  { %v674_v25 = vadd.f32 %v1268_v14, %v673_v22 }
 0x2f3   :  { %595 = vperm.xlu1 %1264, %v572_v21   ;;  %v678_v26 = vsel %vm677_vm2, %v1268_v14, %v674_v25  ;;  %v714_v14 = vrot.slane %v2153_v11, 1  ;;  %vm772_vm2 = vcmask 1047559  }
 0x2f4   :  { %v683_v27 = vsel %vm680_vm3, %v682_v24, %v678_v26  ;;  %v611_v24 = vld [vmem:[#allocation2 + $0x30] sm:$0xff] }
 0x2f5   :  { %592 = vperm.xlu0 %1265, %v571_v23   ;;  %687 = vperm.xlu2 %1266, %v683_v27  }
 0x33f   :  { %v587_v29 = vpop.permute.xlu2 %586 }
 0x340   :  { %vm601_vm4 = vcmp.lt.s32.totalorder %v2142_v30, %v587_v29 }
 0x341   :  { %v617_v32 = vsel %vm601_vm4, %v609_v31, 0.0 }
 0x342   :  { %v645_v34 = vrot.slane %v617_v32, 4 }
 0x344   :  { %v646_v40 = vadd.f32 %v645_v34, %v617_v32 }
 0x346   :  { %v647_v48 = vrot.slane %v646_v40, 2 }
 0x347   :  { %v590_v33 = vpop.permute.xlu2 %589 }
 0x348   :  { %vm602_vm5 = vcmp.lt.s32.totalorder %v2142_v30, %v590_v33  ;;  %v648_v56 = vadd.f32 %v647_v48, %v646_v40 }
 0x349   :  { %v618_v38 = vsel %vm602_vm5, %v610_v35, 0.0  ;;  %v715_v35 = vrot.slane %v2153_v11, 2 }
 0x34a   :  { %v651_v44 = vrot.slane %v618_v38, 4  ;;  %v649_v4 = vrot.slane %v648_v56, 1 }
 0x34c   :  { %v652_v52 = vadd.f32 %v651_v44, %v618_v38  ;;  %v650_v20 = vadd.f32 %v649_v4, %v648_v56 }
 0x34e   :  { %v653_v63 = vrot.slane %v652_v52, 2 }
 0x34f   :  { %v2149_v62 = vpop.permute.xlu2 %687 }
 0x350   :  { %v689_v5 = vrot.slane %v2149_v62, 1  ;;  %v654_v10 = vadd.f32 %v653_v63, %v652_v52  ;;  %v691_v26 = vrot.slane %v2149_v62, 3  ;;  %v692_v33 = vrot.slane %v2149_v62, 4 }
 0x351   :  { %v690_v34 = vrot.slane %v2149_v62, 2 }
 0x352   :  { %v655_v25 = vrot.slane %v654_v10, 1 }
 0x355   :  { %v575_v37 = vpop.permute.xlu1 %574 }
 0x356   :  { %vm597_vm6 = vcmp.lt.s32.totalorder %v2142_v30, %v575_v37 }
 0x357   :  { %v613_v41 = vsel %vm597_vm6, %v605_v36, 0.0  ;;  %v578_v42 = vpop.permute.xlu0 %577 }
 0x358   :  { %v621_v43 = vrot.slane %v613_v41, 4  ;;  %vm598_vm7 = vcmp.lt.s32.totalorder %v2142_v30, %v578_v42 }
 0x359   :  { %v614_v45 = vsel %vm598_vm7, %v606_v39, 0.0 }
 0x35a   :  { %v622_v46 = vadd.f32 %v621_v43, %v613_v41  ;;  %v627_v47 = vrot.slane %v614_v45, 4  ;;  %v693_v41 = vrot.slane %v2149_v62, 5 }
 0x35c   :  { %v623_v49 = vrot.slane %v622_v46, 2  ;;  %v628_v50 = vadd.f32 %v627_v47, %v614_v45  ;;  %v708_v47 = vmul.f32 %v692_v33, %v650_v20 }
 0x35d   :  { %v584_v53 = vpop.permute.xlu1 %583 }
 0x35e   :  { %v629_v54 = vrot.slane %v628_v50, 2  ;;  %vm600_vm8 = vcmp.lt.s32.totalorder %v2142_v30, %v584_v53  ;;  %v624_v59 = vadd.f32 %v623_v49, %v622_v46  ;;  %v717_v46 = vrot.slane %v2153_v11, 4 }
 0x35f   :  { %v616_v57 = vsel %vm600_vm8, %v608_v51, 0.0  ;;  %v581_v58 = vpop.permute.xlu0 %580  ;;  %v718_v53 = vrot.slane %v2153_v11, 5 }
 0x360   :  { %v630_v60 = vadd.f32 %v629_v54, %v628_v50  ;;  %v639_v61 = vrot.slane %v616_v57, 4  ;;  %vm599_vm9 = vcmp.lt.s32.totalorder %v2142_v30, %v581_v58  ;;  %v625_v6 = vrot.slane %v624_v59, 1 }
 0x361   :  { %v615_v0 = vsel %vm599_vm9, %v607_v55, 0.0 }
 0x362   :  { %v631_v1 = vrot.slane %v630_v60, 1  ;;  %v640_v2 = vadd.f32 %v639_v61, %v616_v57  ;;  %v633_v3 = vrot.slane %v615_v0, 4  ;;  %v626_v21 = vadd.f32 %v625_v6, %v624_v59 }
 0x363   :  { %v733_v59 = vsub.f32 %v708_v47, %v717_v46  ;;  %v720_v61 = vrot.slane %v2153_v11, 7 }
 0x364   :  { %v632_v7 = vadd.f32 %v631_v1, %v630_v60  ;;  %v641_v8 = vrot.slane %v640_v2, 2  ;;  %v634_v9 = vadd.f32 %v633_v3, %v615_v0  ;;  %v704_v37 = vmul.f32 %v2149_v62, %v626_v21 }
 0x365   :  { %v596_v12 = vpop.permute.xlu1 %595  ;;  %v695_v60 = vrot.slane %v2149_v62, 7 }
 0x366   :  { %v642_v13 = vadd.f32 %v641_v8, %v640_v2  ;;  %v705_v15 = vmul.f32 %v689_v5, %v632_v7  ;;  %v635_v16 = vrot.slane %v634_v9, 2  ;;  %vm604_vm10 = vcmp.lt.s32.totalorder %v2142_v30, %v596_v12 }
 0x367   :  { %v593_v19 = vpop.permute.xlu0 %592  ;;  %v620_v27 = vsel %vm604_vm10, %v612_v17, 0.0  ;;  %v729_v49 = vsub.f32 %v704_v37, %v2153_v11  ;;  %v694_v8 = vrot.slane %v2149_v62, 6  ;;  %v719_v12 = vrot.slane %v2153_v11, 6 }
 0x368   :  { %v643_v22 = vrot.slane %v642_v13, 1  ;;  %v636_v23 = vadd.f32 %v635_v16, %v634_v9  ;;  %vm603_vm11 = vcmp.lt.s32.totalorder %v2142_v30, %v593_v19  ;;  %v730_v29 = vsub.f32 %v705_v15, %v714_v14 }
 0x369   :  { %v663_v32 = vrot.slane %v620_v27, 4  ;;  %v619_v36 = vsel %vm603_vm11, %v611_v24, 0.0  ;;  %v656_v30 = vadd.f32 %v655_v25, %v654_v10  ;;  %v737_v0 = vmul.f32 %v729_v49, %v729_v49 }
 0x36a   :  { %v644_v28 = vadd.f32 %v643_v22, %v642_v13  ;;  %v637_v31 = vrot.slane %v636_v23, 1  ;;  %v657_v42 = vrot.slane %v619_v36, 4  ;;  %v738_v43 = vmul.f32 %v730_v29, %v730_v29 }
 0x36b   :  { %v664_v40 = vadd.f32 %v663_v32, %v620_v27  ;;  %v709_v55 = vmul.f32 %v693_v41, %v656_v30  ;;  %v741_v9 = vmul.f32 %v733_v59, %v733_v59 }
 0x36c   :  { %v707_v38 = vmul.f32 %v691_v26, %v644_v28  ;;  %v638_v39 = vadd.f32 %v637_v31, %v636_v23  ;;  %v658_v48 = vadd.f32 %v657_v42, %v619_v36  ;;  %v753_v56 = vrot.slane %v738_v43, 7 }
 0x36d   :  { %v665_v45 = vrot.slane %v664_v40, 2  ;;  %v734_v5 = vsub.f32 %v709_v55, %v718_v53  ;;  %v762_v19 = vrot.slane %v741_v9, 4 }
 0x36e   :  { %v706_v44 = vmul.f32 %v690_v34, %v638_v39  ;;  %v732_v50 = vsub.f32 %v707_v38, %v716_v18  ;;  %v659_v54 = vrot.slane %v658_v48, 2  ;;  %v755_v6 = vsel %vm754_vm12, %v753_v56, %v737_v0 }
 0x36f   :  { %v666_v52 = vadd.f32 %v665_v45, %v664_v40  ;;  %v742_v17 = vmul.f32 %v734_v5, %v734_v5 }
 0x370   :  { %v731_v51 = vsub.f32 %v706_v44, %v715_v35  ;;  %v660_v63 = vadd.f32 %v659_v54, %v658_v48  ;;  %v740_v1 = vmul.f32 %v732_v50, %v732_v50 }
 0x371   :  { %v667_v58 = vrot.slane %v666_v52, 1  ;;  %v765_v24 = vrot.slane %v742_v17, 3 }
 0x372   :  { %v739_v57 = vmul.f32 %v731_v51, %v731_v51  ;;  %v661_v4 = vrot.slane %v660_v63, 1  ;;  %v759_v14 = vrot.slane %v740_v1, 5 }
 0x373   :  { %v668_v3 = vadd.f32 %v667_v58, %v666_v52 }
 0x374   :  { %v756_v2 = vrot.slane %v739_v57, 6  ;;  %v662_v13 = vadd.f32 %v661_v4, %v660_v63 }
 0x375   :  { %v711_v7 = vmul.f32 %v695_v60, %v668_v3 }
 0x376   :  { %v758_v10 = vsel %vm757_vm13, %v756_v2, %v755_v6  ;;  %v710_v16 = vmul.f32 %v694_v8, %v662_v13 }
 0x377   :  { %v736_v15 = vsub.f32 %v711_v7, %v720_v61  ;;  %v761_v18 = vsel %vm760_vm14, %v759_v14, %v758_v10 }
 0x378   :  { %v735_v20 = vsub.f32 %v710_v16, %v719_v12  ;;  %v764_v22 = vsel %vm763_vm15, %v762_v19, %v761_v18 }
 0x379   :  { %v744_v21 = vmul.f32 %v736_v15, %v736_v15  ;;  %v767_v26 = vsel %vm766_vm0, %v765_v24, %v764_v22 }
 0x37a   :  { %v743_v23 = vmul.f32 %v735_v20, %v735_v20 }
 0x37b   :  { %v771_v25 = vrot.slane %v744_v21, 1 }
 0x37c   :  { %v768_v62 = vrot.slane %v743_v23, 2 }
 0x37e   :  { %v770_v11 = vsel %vm769_vm1, %v768_v62, %v767_v26 }
 0x37f   :  { %v773_v27 = vsel %vm772_vm2, %v771_v25, %v770_v11 }
 0x380   :  { %775 = vst [vmem:[%s2180_s5] sm:$0xff] %v773_v27 }
 0x381   :  { %780 = vsyncmov [#allocation4] }
 0x384   :  { %s781_s16 = vpop.sfrf %780 }
 0x385   :  { %p1046_p0 = scmp.ne.s32.totalorder %s781_s16, 0 }
 0x387   :  { %785 = shalt.err (%p1046_p0)  }
 0x388   :  { %787 = vsyncmov [#allocation4 + $0x1] }
 0x38b   :  { %s788_s21 = vpop.sfrf %787 }
 0x38c   :  { %p1047_p1 = scmp.ne.s32.totalorder %s788_s21, 0 }
 0x38e   :  { %792 = shalt.err (%p1047_p1)  }
 0x38f   :  { %794 = vsyncmov [#allocation4 + $0x2] }
 0x392   :  { %s795_s22 = vpop.sfrf %794 }
 0x393   :  { %p1048_p2 = scmp.ne.s32.totalorder %s795_s22, 0 }
 0x395   :  { %799 = shalt.err (%p1048_p2)  }
 0x396   :  { %801 = vsyncmov [#allocation4 + $0x3] }
 0x399   :  { %s802_s28 = vpop.sfrf %801 }
 0x39a   :  { %p1049_p3 = scmp.ne.s32.totalorder %s802_s28, 0 }
 0x39c   :  { %806 = shalt.err (%p1049_p3)  }
 0x39d   :  { %808 = vsyncmov [#allocation4 + $0x4] }
 0x3a0   :  { %s809_s8 = vpop.sfrf %808 }
 0x3a1   :  { %p1050_p4 = scmp.ne.s32.totalorder %s809_s8, 0 }
 0x3a3   :  { %813 = shalt.err (%p1050_p4)  }
 0x3a4   :  { %815 = vsyncmov [#allocation4 + $0x5] }
 0x3a7   :  { %s816_s5 = vpop.sfrf %815 }
 0x3a8   :  { %p1051_p5 = scmp.ne.s32.totalorder %s816_s5, 0 }
 0x3aa   :  { %820 = shalt.err (%p1051_p5)  }
 0x3ab   :  { %822 = vsyncmov [#allocation4 + $0x6] }
 0x3ae   :  { %s823_s13 = vpop.sfrf %822 }
 0x3af   :  { %p1052_p6 = scmp.ne.s32.totalorder %s823_s13, 0 }
 0x3b1   :  { %827 = shalt.err (%p1052_p6)  }
 0x3b2   :  { %829 = vsyncmov [#allocation4 + $0x7] }
 0x3b5   :  { %s830_s4 = vpop.sfrf %829 }
 0x3b6   :  { %p1053_p7 = scmp.ne.s32.totalorder %s830_s4, 0 }
 0x3b8   :  { %834 = shalt.err (%p1053_p7)  }
 0x3b9   :  { %835 = vsyncmov [#allocation5] }
 0x3bc   :  { %s836_s15 = vpop.sfrf %835 }
 0x3bd   :  { %p1054_p8 = scmp.ne.s32.totalorder %s836_s15, 0 }
 0x3bf   :  { %840 = shalt.err (%p1054_p8)  }
 0x3c0   :  { %842 = vsyncmov [#allocation5 + $0x1] }
 0x3c3   :  { %s843_s17 = vpop.sfrf %842 }
 0x3c4   :  { %p1055_p9 = scmp.ne.s32.totalorder %s843_s17, 0 }
 0x3c6   :  { %847 = shalt.err (%p1055_p9)  }
 0x3c7   :  { %849 = vsyncmov [#allocation5 + $0x2] }
 0x3ca   :  { %s850_s9 = vpop.sfrf %849 }
 0x3cb   :  { %p1056_p10 = scmp.ne.s32.totalorder %s850_s9, 0 }
 0x3cd   :  { %854 = shalt.err (%p1056_p10)  }
 0x3ce   :  { %856 = vsyncmov [#allocation5 + $0x3] }
 0x3d1   :  { %s857_s18 = vpop.sfrf %856 }
 0x3d2   :  { %p1057_p11 = scmp.ne.s32.totalorder %s857_s18, 0 }
 0x3d4   :  { %861 = shalt.err (%p1057_p11)  }
 0x3d5   :  { %863 = vsyncmov [#allocation5 + $0x4] }
 0x3d8   :  { %s864_s23 = vpop.sfrf %863 }
 0x3d9   :  { %p1058_p12 = scmp.ne.s32.totalorder %s864_s23, 0 }
 0x3db   :  { %868 = shalt.err (%p1058_p12)  }
 0x3dc   :  { %870 = vsyncmov [#allocation5 + $0x5] }
 0x3df   :  { %s871_s25 = vpop.sfrf %870 }
 0x3e0   :  { %p1059_p13 = scmp.ne.s32.totalorder %s871_s25, 0 }
 0x3e2   :  { %875 = shalt.err (%p1059_p13)  }
 0x3e3   :  { %877 = vsyncmov [#allocation5 + $0x6] }
 0x3e6   :  { %s878_s26 = vpop.sfrf %877 }
 0x3e7   :  { %p1060_p0 = scmp.ne.s32.totalorder %s878_s26, 0 }
 0x3e9   :  { %882 = shalt.err (%p1060_p0)  }
 0x3ea   :  { %884 = vsyncmov [#allocation5 + $0x7] }
 0x3ed   :  { %s885_s29 = vpop.sfrf %884 }
 0x3ee   :  { %p1061_p1 = scmp.ne.s32.totalorder %s885_s29, 0 }
 0x3f0   :  { %889 = shalt.err (%p1061_p1)  }

</bundles_post_ra>
